<compile_context>
chip_gen: v7x
topology: tpu7x:2x2x1
jax: 0.10.0
libtpu: 0.0.40
codegen_flags: <defaults>
</compile_context>

<pallas_src>
import functools
import math

import numpy as np
import jax
import jax.numpy as jnp
from jax.experimental import pallas as pl
from jax.experimental.pallas import tpu as pltpu


def _round_up(x, m):
    return (x + m - 1) // m * m


# ----------------------------------------------------------------------------
# Fused Pallas kernel: whole Encoder1D forward for one batch element (grid axis)
# ----------------------------------------------------------------------------
def _encoder1d_kernel(x_ref, w_ref, b_ref, g_ref, o_ref, *,
                      plan, nres, ntop, seg_lens, l_pad):
    """Refs:
      x_ref : (1, C_in, L)       one batch element's input
      w_ref : (n_convs, R, WC)   packed per-conv weights, row o / col k*C_in+c
      b_ref : (n_convs, R, 1)    packed biases
      g_ref : (n_gather, GR, GC) batch-shared gather matrices for strided convs
      o_ref : (1, hc, l_pad)     lane-dense output slab [enc_b | enc_m | enc_t | 0]
    """
    Lb, Lm, Lt = seg_lens
    idx = [0]     # conv counter (trace-time)
    gidx = [0]    # gather-matrix counter (trace-time)

    def conv(x, relu_in=False, relu_out=False):
        i = idx[0]
        idx[0] += 1
        c_in, c_out, K, stride, pad, L_in, L_out = plan[i]
        xin = jnp.maximum(x, 0.0) if relu_in else x

        # ---- im2col tile: (K*c_in, L_out), row order k*c_in + c ----
        if stride == 1:
            if pad > 0:
                z = jnp.zeros((c_in, pad), jnp.float32)
                xp = jnp.concatenate([z, xin, z], axis=1)
            else:
                xp = xin
            taps = [jax.lax.slice(xp, (0, k), (c_in, k + L_out))
                    for k in range(K)]
        else:
            # strided conv: one small batch-shared gather matmul (L_in, K*L_out)
            g = jax.lax.slice(g_ref[gidx[0]], (0, 0), (L_in, K * L_out))
            gidx[0] += 1
            z = jnp.dot(xin, g, preferred_element_type=jnp.float32)
            taps = [jax.lax.slice(z, (0, k * L_out), (c_in, (k + 1) * L_out))
                    for k in range(K)]
        col = taps[0] if K == 1 else jnp.concatenate(taps, axis=0)

        # ---- single fused weight matmul + bias + optional ReLU ----
        w = jax.lax.slice(w_ref[i], (0, 0), (c_out, K * c_in))
        b = jax.lax.slice(b_ref[i], (0, 0), (c_out, 1))
        acc = jnp.dot(w, col, preferred_element_type=jnp.float32) + b
        if relu_out:
            acc = jnp.maximum(acc, 0.0)
        return acc

    def res_block(h):
        # skip = Identity (in_channels == out_channels in this config)
        # out = conv2(dropout(relu(conv1(relu(h))))) + h   (dropout = identity)
        t = conv(h, relu_in=True, relu_out=True)
        return conv(t) + h

    x = x_ref[0].astype(jnp.float32)

    # ---- encoder_b ----
    h = conv(x, relu_out=True)
    h = conv(h, relu_out=True)
    h = conv(h)
    for _ in range(nres):
        h = res_block(h)
    enc_b = jnp.maximum(h, 0.0)

    # ---- encoder_m ----
    h = conv(enc_b)
    for _ in range(nres):
        h = res_block(h)
    enc_m = jnp.maximum(h, 0.0)

    # ---- encoder_t ----
    h = enc_m
    for _ in range(ntop):
        h = conv(h, relu_out=True)
    h = conv(h)
    for _ in range(nres):
        h = res_block(h)
    enc_t = jnp.maximum(h, 0.0)

    # ---- single lane-dense store: [enc_b | enc_m | enc_t | zero pad] ----
    pieces = [enc_b, enc_m, enc_t]
    pad_cols = l_pad - (Lb + Lm + Lt)
    if pad_cols > 0:
        pieces.append(jnp.zeros((enc_b.shape[0], pad_cols), jnp.float32))
    o_ref[0] = jnp.concatenate(pieces, axis=1).astype(o_ref.dtype)


# ----------------------------------------------------------------------------
# Host-side packing (done once) + pallas_call wrapper
# ----------------------------------------------------------------------------
def _gather_matrix(L_in, L_out, K, stride, pad):
    """G[j, k*L_out + l] = 1 iff j == l*stride + k - pad (in range).

    (X @ G)[c, k*L_out + l] == Xpad[c, l*stride + k].  Batch-shared, built
    with vectorized numpy (no per-call Python triple loop).
    """
    G = np.zeros((L_in, K * L_out), np.float32)
    k = np.arange(K)[:, None]
    l = np.arange(L_out)[None, :]
    j = l * stride + k - pad
    valid = (j >= 0) & (j < L_in)
    cols = np.broadcast_to(k * L_out + l, j.shape)
    G[j[valid], cols[valid]] = 1.0
    return G


def build_encoder1d(P, cfg, B, L):
    """Packs parameters into VMEM slabs once and returns a jitted forward fn."""
    hc = cfg["hidden_channels"]
    ds = cfg["downsample_factor"]
    ks = ds * 2
    pad_ds = ks // 2 - ds // 2
    nres = cfg["num_res_blocks"]
    ntop = cfg["num_downsample_layers_top"]

    # Layers in exact execution order: (weight, bias, stride, pad)
    layers = []
    layers.append((*P["b"][0], ds, pad_ds))
    layers.append((*P["b"][1], ds, pad_ds))
    layers.append((*P["b"][2], 1, 1))
    for rp in P["b_res"]:
        layers.append((rp["w1"], rp["b1"], 1, 1))
        layers.append((rp["w2"], rp["b2"], 1, 0))
    n_b = len(layers)
    layers.append((*P["m"][0], 1, 1))
    for rp in P["m_res"]:
        layers.append((rp["w1"], rp["b1"], 1, 1))
        layers.append((rp["w2"], rp["b2"], 1, 0))
    n_m = len(layers)
    for wt, bt in P["t_down"]:
        layers.append((wt, bt, ds, pad_ds))
    layers.append((*P["t_conv"], 1, 1))
    for rp in P["t_res"]:
        layers.append((rp["w1"], rp["b1"], 1, 1))
        layers.append((rp["w2"], rp["b2"], 1, 0))

    # Static per-layer plan + segment output lengths.
    plan = []
    L_cur = L
    Lb = Lm = L
    for li, (w, bias, s, p) in enumerate(layers):
        c_out, c_in, K = (int(d) for d in w.shape)
        L_in = L_cur
        L_out = (L_in + 2 * p - K) // s + 1
        plan.append((c_in, c_out, K, s, p, L_in, L_out))
        L_cur = L_out
        if li == n_b - 1:
            Lb = L_out
        if li == n_m - 1:
            Lm = L_out
    Lt = L_cur

    # Pack weights / biases / gather matrices into 3 slabs (few big DMAs).
    n = len(layers)
    R = _round_up(max(pe[1] for pe in plan), 8)               # max c_out
    WC = _round_up(max(pe[2] * pe[0] for pe in plan), 128)    # max K*c_in
    wslab = np.zeros((n, R, WC), np.float32)
    bslab = np.zeros((n, R, 1), np.float32)
    g_list = []
    for i, ((w, bias, _, _), pe) in enumerate(zip(layers, plan)):
        c_in, c_out, K, s, p, L_in, L_out = pe
        # k-major packing: W2d[o, k*c_in + c] = W[o, c, k]
        w2d = np.transpose(np.asarray(w, np.float32), (0, 2, 1)).reshape(
            c_out, K * c_in)
        wslab[i, :c_out, :K * c_in] = w2d
        bslab[i, :c_out, 0] = np.asarray(bias, np.float32)
        if s != 1:
            g_list.append(_gather_matrix(L_in, L_out, K, s, p))
    if g_list:
        GR = _round_up(max(g.shape[0] for g in g_list), 8)
        GC = _round_up(max(g.shape[1] for g in g_list), 128)
        gslab = np.zeros((len(g_list), GR, GC), np.float32)
        for i, g in enumerate(g_list):
            gslab[i, :g.shape[0], :g.shape[1]] = g
    else:
        gslab = np.zeros((1, 8, 128), np.float32)

    wslab = jnp.asarray(wslab)
    bslab = jnp.asarray(bslab)
    gslab = jnp.asarray(gslab)

    total = Lb + Lm + Lt
    l_pad = _round_up(total, 128)          # lane-dense combined output slab

    kernel = functools.partial(
        _encoder1d_kernel, plan=tuple(plan), nres=nres, ntop=ntop,
        seg_lens=(Lb, Lm, Lt), l_pad=l_pad)

    c_in0 = plan[0][0]
    call = pl.pallas_call(
        kernel,
        grid=(B,),
        in_specs=[
            pl.BlockSpec((1, c_in0, L), lambda b: (b, 0, 0)),
            pl.BlockSpec(wslab.shape, lambda b: (0, 0, 0)),
            pl.BlockSpec(bslab.shape, lambda b: (0, 0, 0)),
            pl.BlockSpec(gslab.shape, lambda b: (0, 0, 0)),
        ],
        out_specs=pl.BlockSpec((1, hc, l_pad), lambda b: (b, 0, 0)),
        out_shape=jax.ShapeDtypeStruct((B, hc, l_pad), jnp.float32),
        compiler_params=pltpu.CompilerParams(
            dimension_semantics=("parallel",)),
    )

    @jax.jit
    def forward(x):
        y = call(x, wslab, bslab, gslab)               # (B, hc, l_pad)
        enc_b = y[:, :, :Lb]
        enc_m = y[:, :, Lb:Lb + Lm]
        enc_t = y[:, :, Lb + Lm:Lb + Lm + Lt]
        return enc_b, enc_m, enc_t

    return forward


# ----------------------------------------------------------------------------
# Parameter construction (PyTorch Conv1d default init ranges)
# ----------------------------------------------------------------------------
def make_params(key, cfg):
    keys = iter(jax.random.split(key, 128))

    def conv_p(c_in, c_out, k):
        bound = 1.0 / math.sqrt(c_in * k)
        w = jax.random.uniform(next(keys), (c_out, c_in, k), jnp.float32,
                               -bound, bound)
        b = jax.random.uniform(next(keys), (c_out,), jnp.float32, -bound, bound)
        return w, b

    def res_p(c, mid):
        w1, b1 = conv_p(c, mid, 3)
        w2, b2 = conv_p(mid, c, 1)
        return dict(w1=w1, b1=b1, w2=w2, b2=b2)

    hc = cfg["hidden_channels"]
    ds = cfg["downsample_factor"]
    ks = ds * 2
    nres = cfg["num_res_blocks"]

    P = {}
    P["b"] = [conv_p(cfg["in_channels"], hc // 2, ks),
              conv_p(hc // 2, hc, ks),
              conv_p(hc, hc, 3)]
    P["b_res"] = [res_p(hc, cfg["res_channels"]) for _ in range(nres)]
    P["m"] = [conv_p(hc, hc, 3)]
    P["m_res"] = [res_p(hc, cfg["res_channels"]) for _ in range(nres)]
    P["t_down"] = [conv_p(hc, hc, ks)
                   for _ in range(cfg["num_downsample_layers_top"])]
    P["t_conv"] = conv_p(hc, hc, 3)
    P["t_res"] = [res_p(hc, cfg["res_channels"]) for _ in range(nres)]
    return P


# ----------------------------------------------------------------------------
# Pure-JAX reference (for self-check only; no Pallas)
# ----------------------------------------------------------------------------
def _ref_conv1d(x, w, b, stride=1, pad=0):
    K = w.shape[2]
    L_in = x.shape[2]
    L_out = (L_in + 2 * pad - K) // stride + 1
    xp = jnp.pad(x, ((0, 0), (0, 0), (pad, pad)))
    taps = [xp[:, :, k:k + stride * (L_out - 1) + 1:stride] for k in range(K)]
    cols = jnp.stack(taps, axis=2)                     # (B, C_in, K, L_out)
    return jnp.einsum("bckl,ock->bol", cols, w) + b[None, :, None]


def _ref_encoder1d(x, P, cfg):
    ds = cfg["downsample_factor"]
    ks = ds * 2
    pad_ds = ks // 2 - ds // 2

    def res(h, p):
        out = jax.nn.relu(h)
        out = jax.nn.relu(_ref_conv1d(out, p["w1"], p["b1"], 1, 1))
        out = _ref_conv1d(out, p["w2"], p["b2"], 1, 0)
        return out + h

    h = jax.nn.relu(_ref_conv1d(x, *P["b"][0], ds, pad_ds))
    h = jax.nn.relu(_ref_conv1d(h, *P["b"][1], ds, pad_ds))
    h = _ref_conv1d(h, *P["b"][2], 1, 1)
    for rp in P["b_res"]:
        h = res(h, rp)
    eb = jax.nn.relu(h)

    h = _ref_conv1d(eb, *P["m"][0], 1, 1)
    for rp in P["m_res"]:
        h = res(h, rp)
    em = jax.nn.relu(h)

    h = em
    for wt, bt in P["t_down"]:
        h = jax.nn.relu(_ref_conv1d(h, wt, bt, ds, pad_ds))
    h = _ref_conv1d(h, *P["t_conv"], 1, 1)
    for rp in P["t_res"]:
        h = res(h, rp)
    et = jax.nn.relu(h)
    return eb, em, et


# ----------------------------------------------------------------------------
if __name__ == "__main__":
    cfg = dict(in_channels=4, hidden_channels=32, num_res_blocks=1,
               res_channels=16, downsample_factor=2,
               num_downsample_layers_top=2, dropout_prob=0.2)

    root = jax.random.PRNGKey(0)
    k_params, k_x = jax.random.split(root)
    params = make_params(k_params, cfg)

    B, L = 2, 32
    x = jax.random.normal(k_x, (B, cfg["in_channels"], L), dtype=jnp.float32)

    fwd = build_encoder1d(params, cfg, B, L)   # slabs packed once, fn is jitted
    enc_b, enc_m, enc_t = fwd(x)
    jax.block_until_ready((enc_b, enc_m, enc_t))

    assert enc_b.shape == (2, 32, 8), enc_b.shape
    assert enc_m.shape == (2, 32, 8), enc_m.shape
    assert enc_t.shape == (2, 32, 2), enc_t.shape

    # Numerical self-check against a pure-JAX reference of the same forward.
    rb, rm, rt = _ref_encoder1d(x, params, cfg)
    for got, want in ((enc_b, rb), (enc_m, rm), (enc_t, rt)):
        err = float(jnp.max(jnp.abs(got - want)))
        assert jnp.allclose(got, want, atol=1e-4, rtol=1e-4), err

    print("KERNEL_OK")
</pallas_src>

<mosaic_0001>
module attributes {stable_mosaic.version = 11 : i64} {
  func.func @_encoder1d_kernel(%arg0: i32, %arg1: memref<1x4x32xf32, #tpu.memory_space<vmem>>, %arg2: memref<13x32x128xf32, #tpu.memory_space<vmem>>, %arg3: memref<13x32x1xf32, #tpu.memory_space<vmem>>, %arg4: memref<4x32x128xf32, #tpu.memory_space<vmem>>, %arg5: memref<1x32x128xf32, #tpu.memory_space<vmem>>) attributes {dimension_semantics = [#tpu.dimension_semantics<parallel>], iteration_bounds = array<i64: 2>, scalar_prefetch = 0 : i64, scratch_operands = 0 : i64, tpu.core_type = #tpu.core_type<tc>, window_params = [{transform_indices = @transform_0, window_bounds = array<i64: 1, 4, 32>}, {pipeline_mode = #tpu.pipeline_mode<synchronous>, transform_indices = @transform_1, window_bounds = array<i64: 13, 32, 128>}, {pipeline_mode = #tpu.pipeline_mode<synchronous>, transform_indices = @transform_2, window_bounds = array<i64: 13, 32, 1>}, {pipeline_mode = #tpu.pipeline_mode<synchronous>, transform_indices = @transform_3, window_bounds = array<i64: 4, 32, 128>}, {transform_indices = @transform_4, window_bounds = array<i64: 1, 32, 128>}]} {
    %c0 = arith.constant 0 : index
    %c0_0 = arith.constant 0 : index
    %c0_1 = arith.constant 0 : index
    %0 = vector.load %arg1[%c0, %c0_0, %c0_1] : memref<1x4x32xf32, #tpu.memory_space<vmem>>, vector<1x4x32xf32>
    %1 = vector.shape_cast %0 : vector<1x4x32xf32> to vector<4x32xf32>
    %c0_2 = arith.constant 0 : index
    %c0_3 = arith.constant 0 : index
    %c0_4 = arith.constant 0 : index
    %2 = vector.load %arg4[%c0_2, %c0_3, %c0_4] : memref<4x32x128xf32, #tpu.memory_space<vmem>>, vector<1x32x128xf32>
    %3 = vector.shape_cast %2 : vector<1x32x128xf32> to vector<32x128xf32>
    %4 = vector.extract_strided_slice %3 {offsets = [0, 0], sizes = [32, 64], strides = [1, 1]} : vector<32x128xf32> to vector<32x64xf32>
    %cst = arith.constant dense<0.000000e+00> : vector<4x64xf32>
    %5 = tpu.matmul %1, %4, %cst {dimension_numbers = #tpu.dot_dimension_numbers<[1], [0], [0], [1], [0, 0, 1, 1], [], []>} : vector<4x32xf32>, vector<32x64xf32>, vector<4x64xf32> -> vector<4x64xf32>
    %6 = vector.extract_strided_slice %5 {offsets = [0, 0], sizes = [4, 16], strides = [1, 1]} : vector<4x64xf32> to vector<4x16xf32>
    %7 = vector.extract_strided_slice %5 {offsets = [0, 16], sizes = [4, 16], strides = [1, 1]} : vector<4x64xf32> to vector<4x16xf32>
    %8 = vector.extract_strided_slice %5 {offsets = [0, 32], sizes = [4, 16], strides = [1, 1]} : vector<4x64xf32> to vector<4x16xf32>
    %9 = vector.extract_strided_slice %5 {offsets = [0, 48], sizes = [4, 16], strides = [1, 1]} : vector<4x64xf32> to vector<4x16xf32>
    %10 = tpu.concatenate %6, %7, %8, %9 in 0 : vector<4x16xf32>, vector<4x16xf32>, vector<4x16xf32>, vector<4x16xf32> -> vector<16x16xf32>
    %c0_5 = arith.constant 0 : index
    %c0_6 = arith.constant 0 : index
    %c0_7 = arith.constant 0 : index
    %11 = vector.load %arg2[%c0_5, %c0_6, %c0_7] : memref<13x32x128xf32, #tpu.memory_space<vmem>>, vector<1x32x128xf32>
    %12 = vector.shape_cast %11 : vector<1x32x128xf32> to vector<32x128xf32>
    %13 = vector.extract_strided_slice %12 {offsets = [0, 0], sizes = [16, 16], strides = [1, 1]} : vector<32x128xf32> to vector<16x16xf32>
    %c0_8 = arith.constant 0 : index
    %c0_9 = arith.constant 0 : index
    %c0_10 = arith.constant 0 : index
    %14 = vector.load %arg3[%c0_8, %c0_9, %c0_10] : memref<13x32x1xf32, #tpu.memory_space<vmem>>, vector<1x32x1xf32>
    %15 = vector.shape_cast %14 : vector<1x32x1xf32> to vector<32x1xf32>
    %16 = vector.extract_strided_slice %15 {offsets = [0, 0], sizes = [16, 1], strides = [1, 1]} : vector<32x1xf32> to vector<16x1xf32>
    %cst_11 = arith.constant dense<0.000000e+00> : vector<16x16xf32>
    %17 = tpu.matmul %13, %10, %cst_11 {dimension_numbers = #tpu.dot_dimension_numbers<[1], [0], [0], [1], [0, 0, 1, 1], [], []>} : vector<16x16xf32>, vector<16x16xf32>, vector<16x16xf32> -> vector<16x16xf32>
    %18 = vector.broadcast %16 : vector<16x1xf32> to vector<16x16xf32>
    %19 = arith.addf %17, %18 : vector<16x16xf32>
    %cst_12 = arith.constant 0.000000e+00 : f32
    %20 = vector.broadcast %cst_12 : f32 to vector<16x16xf32>
    %21 = arith.maximumf %19, %20 : vector<16x16xf32>
    %c1 = arith.constant 1 : index
    %c0_13 = arith.constant 0 : index
    %c0_14 = arith.constant 0 : index
    %22 = vector.load %arg4[%c1, %c0_13, %c0_14] : memref<4x32x128xf32, #tpu.memory_space<vmem>>, vector<1x32x128xf32>
    %23 = vector.shape_cast %22 : vector<1x32x128xf32> to vector<32x128xf32>
    %24 = vector.extract_strided_slice %23 {offsets = [0, 0], sizes = [16, 32], strides = [1, 1]} : vector<32x128xf32> to vector<16x32xf32>
    %cst_15 = arith.constant dense<0.000000e+00> : vector<16x32xf32>
    %25 = tpu.matmul %21, %24, %cst_15 {dimension_numbers = #tpu.dot_dimension_numbers<[1], [0], [0], [1], [0, 0, 1, 1], [], []>} : vector<16x16xf32>, vector<16x32xf32>, vector<16x32xf32> -> vector<16x32xf32>
    %26 = vector.extract_strided_slice %25 {offsets = [0, 0], sizes = [16, 8], strides = [1, 1]} : vector<16x32xf32> to vector<16x8xf32>
    %27 = vector.extract_strided_slice %25 {offsets = [0, 8], sizes = [16, 8], strides = [1, 1]} : vector<16x32xf32> to vector<16x8xf32>
    %28 = vector.extract_strided_slice %25 {offsets = [0, 16], sizes = [16, 8], strides = [1, 1]} : vector<16x32xf32> to vector<16x8xf32>
    %29 = vector.extract_strided_slice %25 {offsets = [0, 24], sizes = [16, 8], strides = [1, 1]} : vector<16x32xf32> to vector<16x8xf32>
    %30 = tpu.concatenate %26, %27, %28, %29 in 0 : vector<16x8xf32>, vector<16x8xf32>, vector<16x8xf32>, vector<16x8xf32> -> vector<64x8xf32>
    %c1_16 = arith.constant 1 : index
    %c0_17 = arith.constant 0 : index
    %c0_18 = arith.constant 0 : index
    %31 = vector.load %arg2[%c1_16, %c0_17, %c0_18] : memref<13x32x128xf32, #tpu.memory_space<vmem>>, vector<1x32x128xf32>
    %32 = vector.shape_cast %31 : vector<1x32x128xf32> to vector<32x128xf32>
    %33 = vector.extract_strided_slice %32 {offsets = [0, 0], sizes = [32, 64], strides = [1, 1]} : vector<32x128xf32> to vector<32x64xf32>
    %c1_19 = arith.constant 1 : index
    %c0_20 = arith.constant 0 : index
    %c0_21 = arith.constant 0 : index
    %34 = vector.load %arg3[%c1_19, %c0_20, %c0_21] : memref<13x32x1xf32, #tpu.memory_space<vmem>>, vector<1x32x1xf32>
    %35 = vector.shape_cast %34 : vector<1x32x1xf32> to vector<32x1xf32>
    %36 = vector.extract_strided_slice %35 {offsets = [0, 0], sizes = [32, 1], strides = [1, 1]} : vector<32x1xf32> to vector<32x1xf32>
    %cst_22 = arith.constant dense<0.000000e+00> : vector<32x8xf32>
    %37 = tpu.matmul %33, %30, %cst_22 {dimension_numbers = #tpu.dot_dimension_numbers<[1], [0], [0], [1], [0, 0, 1, 1], [], []>} : vector<32x64xf32>, vector<64x8xf32>, vector<32x8xf32> -> vector<32x8xf32>
    %38 = vector.broadcast %36 : vector<32x1xf32> to vector<32x8xf32>
    %39 = arith.addf %37, %38 : vector<32x8xf32>
    %cst_23 = arith.constant 0.000000e+00 : f32
    %40 = vector.broadcast %cst_23 : f32 to vector<32x8xf32>
    %41 = arith.maximumf %39, %40 : vector<32x8xf32>
    %cst_24 = arith.constant 0.000000e+00 : f32
    %42 = vector.broadcast %cst_24 : f32 to vector<32x1xf32>
    %43 = tpu.concatenate %42, %41, %42 in 1 : vector<32x1xf32>, vector<32x8xf32>, vector<32x1xf32> -> vector<32x10xf32>
    %44 = vector.extract_strided_slice %43 {offsets = [0, 0], sizes = [32, 8], strides = [1, 1]} : vector<32x10xf32> to vector<32x8xf32>
    %45 = vector.extract_strided_slice %43 {offsets = [0, 1], sizes = [32, 8], strides = [1, 1]} : vector<32x10xf32> to vector<32x8xf32>
    %46 = vector.extract_strided_slice %43 {offsets = [0, 2], sizes = [32, 8], strides = [1, 1]} : vector<32x10xf32> to vector<32x8xf32>
    %47 = tpu.concatenate %44, %45, %46 in 0 : vector<32x8xf32>, vector<32x8xf32>, vector<32x8xf32> -> vector<96x8xf32>
    %c2 = arith.constant 2 : index
    %c0_25 = arith.constant 0 : index
    %c0_26 = arith.constant 0 : index
    %48 = vector.load %arg2[%c2, %c0_25, %c0_26] : memref<13x32x128xf32, #tpu.memory_space<vmem>>, vector<1x32x128xf32>
    %49 = vector.shape_cast %48 : vector<1x32x128xf32> to vector<32x128xf32>
    %50 = vector.extract_strided_slice %49 {offsets = [0, 0], sizes = [32, 96], strides = [1, 1]} : vector<32x128xf32> to vector<32x96xf32>
    %c2_27 = arith.constant 2 : index
    %c0_28 = arith.constant 0 : index
    %c0_29 = arith.constant 0 : index
    %51 = vector.load %arg3[%c2_27, %c0_28, %c0_29] : memref<13x32x1xf32, #tpu.memory_space<vmem>>, vector<1x32x1xf32>
    %52 = vector.shape_cast %51 : vector<1x32x1xf32> to vector<32x1xf32>
    %53 = vector.extract_strided_slice %52 {offsets = [0, 0], sizes = [32, 1], strides = [1, 1]} : vector<32x1xf32> to vector<32x1xf32>
    %cst_30 = arith.constant dense<0.000000e+00> : vector<32x8xf32>
    %54 = tpu.matmul %50, %47, %cst_30 {dimension_numbers = #tpu.dot_dimension_numbers<[1], [0], [0], [1], [0, 0, 1, 1], [], []>} : vector<32x96xf32>, vector<96x8xf32>, vector<32x8xf32> -> vector<32x8xf32>
    %55 = vector.broadcast %53 : vector<32x1xf32> to vector<32x8xf32>
    %56 = arith.addf %54, %55 : vector<32x8xf32>
    %cst_31 = arith.constant 0.000000e+00 : f32
    %57 = vector.broadcast %cst_31 : f32 to vector<32x8xf32>
    %58 = arith.maximumf %56, %57 : vector<32x8xf32>
    %cst_32 = arith.constant 0.000000e+00 : f32
    %59 = vector.broadcast %cst_32 : f32 to vector<32x1xf32>
    %60 = tpu.concatenate %59, %58, %59 in 1 : vector<32x1xf32>, vector<32x8xf32>, vector<32x1xf32> -> vector<32x10xf32>
    %61 = vector.extract_strided_slice %60 {offsets = [0, 0], sizes = [32, 8], strides = [1, 1]} : vector<32x10xf32> to vector<32x8xf32>
    %62 = vector.extract_strided_slice %60 {offsets = [0, 1], sizes = [32, 8], strides = [1, 1]} : vector<32x10xf32> to vector<32x8xf32>
    %63 = vector.extract_strided_slice %60 {offsets = [0, 2], sizes = [32, 8], strides = [1, 1]} : vector<32x10xf32> to vector<32x8xf32>
    %64 = tpu.concatenate %61, %62, %63 in 0 : vector<32x8xf32>, vector<32x8xf32>, vector<32x8xf32> -> vector<96x8xf32>
    %c3 = arith.constant 3 : index
    %c0_33 = arith.constant 0 : index
    %c0_34 = arith.constant 0 : index
    %65 = vector.load %arg2[%c3, %c0_33, %c0_34] : memref<13x32x128xf32, #tpu.memory_space<vmem>>, vector<1x32x128xf32>
    %66 = vector.shape_cast %65 : vector<1x32x128xf32> to vector<32x128xf32>
    %67 = vector.extract_strided_slice %66 {offsets = [0, 0], sizes = [16, 96], strides = [1, 1]} : vector<32x128xf32> to vector<16x96xf32>
    %c3_35 = arith.constant 3 : index
    %c0_36 = arith.constant 0 : index
    %c0_37 = arith.constant 0 : index
    %68 = vector.load %arg3[%c3_35, %c0_36, %c0_37] : memref<13x32x1xf32, #tpu.memory_space<vmem>>, vector<1x32x1xf32>
    %69 = vector.shape_cast %68 : vector<1x32x1xf32> to vector<32x1xf32>
    %70 = vector.extract_strided_slice %69 {offsets = [0, 0], sizes = [16, 1], strides = [1, 1]} : vector<32x1xf32> to vector<16x1xf32>
    %cst_38 = arith.constant dense<0.000000e+00> : vector<16x8xf32>
    %71 = tpu.matmul %67, %64, %cst_38 {dimension_numbers = #tpu.dot_dimension_numbers<[1], [0], [0], [1], [0, 0, 1, 1], [], []>} : vector<16x96xf32>, vector<96x8xf32>, vector<16x8xf32> -> vector<16x8xf32>
    %72 = vector.broadcast %70 : vector<16x1xf32> to vector<16x8xf32>
    %73 = arith.addf %71, %72 : vector<16x8xf32>
    %cst_39 = arith.constant 0.000000e+00 : f32
    %74 = vector.broadcast %cst_39 : f32 to vector<16x8xf32>
    %75 = arith.maximumf %73, %74 : vector<16x8xf32>
    %76 = vector.extract_strided_slice %75 {offsets = [0, 0], sizes = [16, 8], strides = [1, 1]} : vector<16x8xf32> to vector<16x8xf32>
    %c4 = arith.constant 4 : index
    %c0_40 = arith.constant 0 : index
    %c0_41 = arith.constant 0 : index
    %77 = vector.load %arg2[%c4, %c0_40, %c0_41] : memref<13x32x128xf32, #tpu.memory_space<vmem>>, vector<1x32x128xf32>
    %78 = vector.shape_cast %77 : vector<1x32x128xf32> to vector<32x128xf32>
    %79 = vector.extract_strided_slice %78 {offsets = [0, 0], sizes = [32, 16], strides = [1, 1]} : vector<32x128xf32> to vector<32x16xf32>
    %c4_42 = arith.constant 4 : index
    %c0_43 = arith.constant 0 : index
    %c0_44 = arith.constant 0 : index
    %80 = vector.load %arg3[%c4_42, %c0_43, %c0_44] : memref<13x32x1xf32, #tpu.memory_space<vmem>>, vector<1x32x1xf32>
    %81 = vector.shape_cast %80 : vector<1x32x1xf32> to vector<32x1xf32>
    %82 = vector.extract_strided_slice %81 {offsets = [0, 0], sizes = [32, 1], strides = [1, 1]} : vector<32x1xf32> to vector<32x1xf32>
    %cst_45 = arith.constant dense<0.000000e+00> : vector<32x8xf32>
    %83 = tpu.matmul %79, %76, %cst_45 {dimension_numbers = #tpu.dot_dimension_numbers<[1], [0], [0], [1], [0, 0, 1, 1], [], []>} : vector<32x16xf32>, vector<16x8xf32>, vector<32x8xf32> -> vector<32x8xf32>
    %84 = vector.broadcast %82 : vector<32x1xf32> to vector<32x8xf32>
    %85 = arith.addf %83, %84 : vector<32x8xf32>
    %86 = arith.addf %85, %56 : vector<32x8xf32>
    %cst_46 = arith.constant 0.000000e+00 : f32
    %87 = vector.broadcast %cst_46 : f32 to vector<32x8xf32>
    %88 = arith.maximumf %86, %87 : vector<32x8xf32>
    %cst_47 = arith.constant 0.000000e+00 : f32
    %89 = vector.broadcast %cst_47 : f32 to vector<32x1xf32>
    %90 = tpu.concatenate %89, %88, %89 in 1 : vector<32x1xf32>, vector<32x8xf32>, vector<32x1xf32> -> vector<32x10xf32>
    %91 = vector.extract_strided_slice %90 {offsets = [0, 0], sizes = [32, 8], strides = [1, 1]} : vector<32x10xf32> to vector<32x8xf32>
    %92 = vector.extract_strided_slice %90 {offsets = [0, 1], sizes = [32, 8], strides = [1, 1]} : vector<32x10xf32> to vector<32x8xf32>
    %93 = vector.extract_strided_slice %90 {offsets = [0, 2], sizes = [32, 8], strides = [1, 1]} : vector<32x10xf32> to vector<32x8xf32>
    %94 = tpu.concatenate %91, %92, %93 in 0 : vector<32x8xf32>, vector<32x8xf32>, vector<32x8xf32> -> vector<96x8xf32>
    %c5 = arith.constant 5 : index
    %c0_48 = arith.constant 0 : index
    %c0_49 = arith.constant 0 : index
    %95 = vector.load %arg2[%c5, %c0_48, %c0_49] : memref<13x32x128xf32, #tpu.memory_space<vmem>>, vector<1x32x128xf32>
    %96 = vector.shape_cast %95 : vector<1x32x128xf32> to vector<32x128xf32>
    %97 = vector.extract_strided_slice %96 {offsets = [0, 0], sizes = [32, 96], strides = [1, 1]} : vector<32x128xf32> to vector<32x96xf32>
    %c5_50 = arith.constant 5 : index
    %c0_51 = arith.constant 0 : index
    %c0_52 = arith.constant 0 : index
    %98 = vector.load %arg3[%c5_50, %c0_51, %c0_52] : memref<13x32x1xf32, #tpu.memory_space<vmem>>, vector<1x32x1xf32>
    %99 = vector.shape_cast %98 : vector<1x32x1xf32> to vector<32x1xf32>
    %100 = vector.extract_strided_slice %99 {offsets = [0, 0], sizes = [32, 1], strides = [1, 1]} : vector<32x1xf32> to vector<32x1xf32>
    %cst_53 = arith.constant dense<0.000000e+00> : vector<32x8xf32>
    %101 = tpu.matmul %97, %94, %cst_53 {dimension_numbers = #tpu.dot_dimension_numbers<[1], [0], [0], [1], [0, 0, 1, 1], [], []>} : vector<32x96xf32>, vector<96x8xf32>, vector<32x8xf32> -> vector<32x8xf32>
    %102 = vector.broadcast %100 : vector<32x1xf32> to vector<32x8xf32>
    %103 = arith.addf %101, %102 : vector<32x8xf32>
    %cst_54 = arith.constant 0.000000e+00 : f32
    %104 = vector.broadcast %cst_54 : f32 to vector<32x8xf32>
    %105 = arith.maximumf %103, %104 : vector<32x8xf32>
    %cst_55 = arith.constant 0.000000e+00 : f32
    %106 = vector.broadcast %cst_55 : f32 to vector<32x1xf32>
    %107 = tpu.concatenate %106, %105, %106 in 1 : vector<32x1xf32>, vector<32x8xf32>, vector<32x1xf32> -> vector<32x10xf32>
    %108 = vector.extract_strided_slice %107 {offsets = [0, 0], sizes = [32, 8], strides = [1, 1]} : vector<32x10xf32> to vector<32x8xf32>
    %109 = vector.extract_strided_slice %107 {offsets = [0, 1], sizes = [32, 8], strides = [1, 1]} : vector<32x10xf32> to vector<32x8xf32>
    %110 = vector.extract_strided_slice %107 {offsets = [0, 2], sizes = [32, 8], strides = [1, 1]} : vector<32x10xf32> to vector<32x8xf32>
    %111 = tpu.concatenate %108, %109, %110 in 0 : vector<32x8xf32>, vector<32x8xf32>, vector<32x8xf32> -> vector<96x8xf32>
    %c6 = arith.constant 6 : index
    %c0_56 = arith.constant 0 : index
    %c0_57 = arith.constant 0 : index
    %112 = vector.load %arg2[%c6, %c0_56, %c0_57] : memref<13x32x128xf32, #tpu.memory_space<vmem>>, vector<1x32x128xf32>
    %113 = vector.shape_cast %112 : vector<1x32x128xf32> to vector<32x128xf32>
    %114 = vector.extract_strided_slice %113 {offsets = [0, 0], sizes = [16, 96], strides = [1, 1]} : vector<32x128xf32> to vector<16x96xf32>
    %c6_58 = arith.constant 6 : index
    %c0_59 = arith.constant 0 : index
    %c0_60 = arith.constant 0 : index
    %115 = vector.load %arg3[%c6_58, %c0_59, %c0_60] : memref<13x32x1xf32, #tpu.memory_space<vmem>>, vector<1x32x1xf32>
    %116 = vector.shape_cast %115 : vector<1x32x1xf32> to vector<32x1xf32>
    %117 = vector.extract_strided_slice %116 {offsets = [0, 0], sizes = [16, 1], strides = [1, 1]} : vector<32x1xf32> to vector<16x1xf32>
    %cst_61 = arith.constant dense<0.000000e+00> : vector<16x8xf32>
    %118 = tpu.matmul %114, %111, %cst_61 {dimension_numbers = #tpu.dot_dimension_numbers<[1], [0], [0], [1], [0, 0, 1, 1], [], []>} : vector<16x96xf32>, vector<96x8xf32>, vector<16x8xf32> -> vector<16x8xf32>
    %119 = vector.broadcast %117 : vector<16x1xf32> to vector<16x8xf32>
    %120 = arith.addf %118, %119 : vector<16x8xf32>
    %cst_62 = arith.constant 0.000000e+00 : f32
    %121 = vector.broadcast %cst_62 : f32 to vector<16x8xf32>
    %122 = arith.maximumf %120, %121 : vector<16x8xf32>
    %123 = vector.extract_strided_slice %122 {offsets = [0, 0], sizes = [16, 8], strides = [1, 1]} : vector<16x8xf32> to vector<16x8xf32>
    %c7 = arith.constant 7 : index
    %c0_63 = arith.constant 0 : index
    %c0_64 = arith.constant 0 : index
    %124 = vector.load %arg2[%c7, %c0_63, %c0_64] : memref<13x32x128xf32, #tpu.memory_space<vmem>>, vector<1x32x128xf32>
    %125 = vector.shape_cast %124 : vector<1x32x128xf32> to vector<32x128xf32>
    %126 = vector.extract_strided_slice %125 {offsets = [0, 0], sizes = [32, 16], strides = [1, 1]} : vector<32x128xf32> to vector<32x16xf32>
    %c7_65 = arith.constant 7 : index
    %c0_66 = arith.constant 0 : index
    %c0_67 = arith.constant 0 : index
    %127 = vector.load %arg3[%c7_65, %c0_66, %c0_67] : memref<13x32x1xf32, #tpu.memory_space<vmem>>, vector<1x32x1xf32>
    %128 = vector.shape_cast %127 : vector<1x32x1xf32> to vector<32x1xf32>
    %129 = vector.extract_strided_slice %128 {offsets = [0, 0], sizes = [32, 1], strides = [1, 1]} : vector<32x1xf32> to vector<32x1xf32>
    %cst_68 = arith.constant dense<0.000000e+00> : vector<32x8xf32>
    %130 = tpu.matmul %126, %123, %cst_68 {dimension_numbers = #tpu.dot_dimension_numbers<[1], [0], [0], [1], [0, 0, 1, 1], [], []>} : vector<32x16xf32>, vector<16x8xf32>, vector<32x8xf32> -> vector<32x8xf32>
    %131 = vector.broadcast %129 : vector<32x1xf32> to vector<32x8xf32>
    %132 = arith.addf %130, %131 : vector<32x8xf32>
    %133 = arith.addf %132, %103 : vector<32x8xf32>
    %cst_69 = arith.constant 0.000000e+00 : f32
    %134 = vector.broadcast %cst_69 : f32 to vector<32x8xf32>
    %135 = arith.maximumf %133, %134 : vector<32x8xf32>
    %c2_70 = arith.constant 2 : index
    %c0_71 = arith.constant 0 : index
    %c0_72 = arith.constant 0 : index
    %136 = vector.load %arg4[%c2_70, %c0_71, %c0_72] : memref<4x32x128xf32, #tpu.memory_space<vmem>>, vector<1x32x128xf32>
    %137 = vector.shape_cast %136 : vector<1x32x128xf32> to vector<32x128xf32>
    %138 = vector.extract_strided_slice %137 {offsets = [0, 0], sizes = [8, 16], strides = [1, 1]} : vector<32x128xf32> to vector<8x16xf32>
    %cst_73 = arith.constant dense<0.000000e+00> : vector<32x16xf32>
    %139 = tpu.matmul %135, %138, %cst_73 {dimension_numbers = #tpu.dot_dimension_numbers<[1], [0], [0], [1], [0, 0, 1, 1], [], []>} : vector<32x8xf32>, vector<8x16xf32>, vector<32x16xf32> -> vector<32x16xf32>
    %140 = vector.extract_strided_slice %139 {offsets = [0, 0], sizes = [32, 4], strides = [1, 1]} : vector<32x16xf32> to vector<32x4xf32>
    %141 = vector.extract_strided_slice %139 {offsets = [0, 4], sizes = [32, 4], strides = [1, 1]} : vector<32x16xf32> to vector<32x4xf32>
    %142 = vector.extract_strided_slice %139 {offsets = [0, 8], sizes = [32, 4], strides = [1, 1]} : vector<32x16xf32> to vector<32x4xf32>
    %143 = vector.extract_strided_slice %139 {offsets = [0, 12], sizes = [32, 4], strides = [1, 1]} : vector<32x16xf32> to vector<32x4xf32>
    %144 = tpu.concatenate %140, %141, %142, %143 in 0 : vector<32x4xf32>, vector<32x4xf32>, vector<32x4xf32>, vector<32x4xf32> -> vector<128x4xf32>
    %c8 = arith.constant 8 : index
    %c0_74 = arith.constant 0 : index
    %c0_75 = arith.constant 0 : index
    %145 = vector.load %arg2[%c8, %c0_74, %c0_75] : memref<13x32x128xf32, #tpu.memory_space<vmem>>, vector<1x32x128xf32>
    %146 = vector.shape_cast %145 : vector<1x32x128xf32> to vector<32x128xf32>
    %147 = vector.extract_strided_slice %146 {offsets = [0, 0], sizes = [32, 128], strides = [1, 1]} : vector<32x128xf32> to vector<32x128xf32>
    %c8_76 = arith.constant 8 : index
    %c0_77 = arith.constant 0 : index
    %c0_78 = arith.constant 0 : index
    %148 = vector.load %arg3[%c8_76, %c0_77, %c0_78] : memref<13x32x1xf32, #tpu.memory_space<vmem>>, vector<1x32x1xf32>
    %149 = vector.shape_cast %148 : vector<1x32x1xf32> to vector<32x1xf32>
    %150 = vector.extract_strided_slice %149 {offsets = [0, 0], sizes = [32, 1], strides = [1, 1]} : vector<32x1xf32> to vector<32x1xf32>
    %cst_79 = arith.constant dense<0.000000e+00> : vector<32x4xf32>
    %151 = tpu.matmul %147, %144, %cst_79 {dimension_numbers = #tpu.dot_dimension_numbers<[1], [0], [0], [1], [0, 0, 1, 1], [], []>} : vector<32x128xf32>, vector<128x4xf32>, vector<32x4xf32> -> vector<32x4xf32>
    %152 = vector.broadcast %150 : vector<32x1xf32> to vector<32x4xf32>
    %153 = arith.addf %151, %152 : vector<32x4xf32>
    %cst_80 = arith.constant 0.000000e+00 : f32
    %154 = vector.broadcast %cst_80 : f32 to vector<32x4xf32>
    %155 = arith.maximumf %153, %154 : vector<32x4xf32>
    %c3_81 = arith.constant 3 : index
    %c0_82 = arith.constant 0 : index
    %c0_83 = arith.constant 0 : index
    %156 = vector.load %arg4[%c3_81, %c0_82, %c0_83] : memref<4x32x128xf32, #tpu.memory_space<vmem>>, vector<1x32x128xf32>
    %157 = vector.shape_cast %156 : vector<1x32x128xf32> to vector<32x128xf32>
    %158 = vector.extract_strided_slice %157 {offsets = [0, 0], sizes = [4, 8], strides = [1, 1]} : vector<32x128xf32> to vector<4x8xf32>
    %cst_84 = arith.constant dense<0.000000e+00> : vector<32x8xf32>
    %159 = tpu.matmul %155, %158, %cst_84 {dimension_numbers = #tpu.dot_dimension_numbers<[1], [0], [0], [1], [0, 0, 1, 1], [], []>} : vector<32x4xf32>, vector<4x8xf32>, vector<32x8xf32> -> vector<32x8xf32>
    %160 = vector.extract_strided_slice %159 {offsets = [0, 0], sizes = [32, 2], strides = [1, 1]} : vector<32x8xf32> to vector<32x2xf32>
    %161 = vector.extract_strided_slice %159 {offsets = [0, 2], sizes = [32, 2], strides = [1, 1]} : vector<32x8xf32> to vector<32x2xf32>
    %162 = vector.extract_strided_slice %159 {offsets = [0, 4], sizes = [32, 2], strides = [1, 1]} : vector<32x8xf32> to vector<32x2xf32>
    %163 = vector.extract_strided_slice %159 {offsets = [0, 6], sizes = [32, 2], strides = [1, 1]} : vector<32x8xf32> to vector<32x2xf32>
    %164 = tpu.concatenate %160, %161, %162, %163 in 0 : vector<32x2xf32>, vector<32x2xf32>, vector<32x2xf32>, vector<32x2xf32> -> vector<128x2xf32>
    %c9 = arith.constant 9 : index
    %c0_85 = arith.constant 0 : index
    %c0_86 = arith.constant 0 : index
    %165 = vector.load %arg2[%c9, %c0_85, %c0_86] : memref<13x32x128xf32, #tpu.memory_space<vmem>>, vector<1x32x128xf32>
    %166 = vector.shape_cast %165 : vector<1x32x128xf32> to vector<32x128xf32>
    %167 = vector.extract_strided_slice %166 {offsets = [0, 0], sizes = [32, 128], strides = [1, 1]} : vector<32x128xf32> to vector<32x128xf32>
    %c9_87 = arith.constant 9 : index
    %c0_88 = arith.constant 0 : index
    %c0_89 = arith.constant 0 : index
    %168 = vector.load %arg3[%c9_87, %c0_88, %c0_89] : memref<13x32x1xf32, #tpu.memory_space<vmem>>, vector<1x32x1xf32>
    %169 = vector.shape_cast %168 : vector<1x32x1xf32> to vector<32x1xf32>
    %170 = vector.extract_strided_slice %169 {offsets = [0, 0], sizes = [32, 1], strides = [1, 1]} : vector<32x1xf32> to vector<32x1xf32>
    %cst_90 = arith.constant dense<0.000000e+00> : vector<32x2xf32>
    %171 = tpu.matmul %167, %164, %cst_90 {dimension_numbers = #tpu.dot_dimension_numbers<[1], [0], [0], [1], [0, 0, 1, 1], [], []>} : vector<32x128xf32>, vector<128x2xf32>, vector<32x2xf32> -> vector<32x2xf32>
    %172 = vector.broadcast %170 : vector<32x1xf32> to vector<32x2xf32>
    %173 = arith.addf %171, %172 : vector<32x2xf32>
    %cst_91 = arith.constant 0.000000e+00 : f32
    %174 = vector.broadcast %cst_91 : f32 to vector<32x2xf32>
    %175 = arith.maximumf %173, %174 : vector<32x2xf32>
    %cst_92 = arith.constant 0.000000e+00 : f32
    %176 = vector.broadcast %cst_92 : f32 to vector<32x1xf32>
    %177 = tpu.concatenate %176, %175, %176 in 1 : vector<32x1xf32>, vector<32x2xf32>, vector<32x1xf32> -> vector<32x4xf32>
    %178 = vector.extract_strided_slice %177 {offsets = [0, 0], sizes = [32, 2], strides = [1, 1]} : vector<32x4xf32> to vector<32x2xf32>
    %179 = vector.extract_strided_slice %177 {offsets = [0, 1], sizes = [32, 2], strides = [1, 1]} : vector<32x4xf32> to vector<32x2xf32>
    %180 = vector.extract_strided_slice %177 {offsets = [0, 2], sizes = [32, 2], strides = [1, 1]} : vector<32x4xf32> to vector<32x2xf32>
    %181 = tpu.concatenate %178, %179, %180 in 0 : vector<32x2xf32>, vector<32x2xf32>, vector<32x2xf32> -> vector<96x2xf32>
    %c10 = arith.constant 10 : index
    %c0_93 = arith.constant 0 : index
    %c0_94 = arith.constant 0 : index
    %182 = vector.load %arg2[%c10, %c0_93, %c0_94] : memref<13x32x128xf32, #tpu.memory_space<vmem>>, vector<1x32x128xf32>
    %183 = vector.shape_cast %182 : vector<1x32x128xf32> to vector<32x128xf32>
    %184 = vector.extract_strided_slice %183 {offsets = [0, 0], sizes = [32, 96], strides = [1, 1]} : vector<32x128xf32> to vector<32x96xf32>
    %c10_95 = arith.constant 10 : index
    %c0_96 = arith.constant 0 : index
    %c0_97 = arith.constant 0 : index
    %185 = vector.load %arg3[%c10_95, %c0_96, %c0_97] : memref<13x32x1xf32, #tpu.memory_space<vmem>>, vector<1x32x1xf32>
    %186 = vector.shape_cast %185 : vector<1x32x1xf32> to vector<32x1xf32>
    %187 = vector.extract_strided_slice %186 {offsets = [0, 0], sizes = [32, 1], strides = [1, 1]} : vector<32x1xf32> to vector<32x1xf32>
    %cst_98 = arith.constant dense<0.000000e+00> : vector<32x2xf32>
    %188 = tpu.matmul %184, %181, %cst_98 {dimension_numbers = #tpu.dot_dimension_numbers<[1], [0], [0], [1], [0, 0, 1, 1], [], []>} : vector<32x96xf32>, vector<96x2xf32>, vector<32x2xf32> -> vector<32x2xf32>
    %189 = vector.broadcast %187 : vector<32x1xf32> to vector<32x2xf32>
    %190 = arith.addf %188, %189 : vector<32x2xf32>
    %cst_99 = arith.constant 0.000000e+00 : f32
    %191 = vector.broadcast %cst_99 : f32 to vector<32x2xf32>
    %192 = arith.maximumf %190, %191 : vector<32x2xf32>
    %cst_100 = arith.constant 0.000000e+00 : f32
    %193 = vector.broadcast %cst_100 : f32 to vector<32x1xf32>
    %194 = tpu.concatenate %193, %192, %193 in 1 : vector<32x1xf32>, vector<32x2xf32>, vector<32x1xf32> -> vector<32x4xf32>
    %195 = vector.extract_strided_slice %194 {offsets = [0, 0], sizes = [32, 2], strides = [1, 1]} : vector<32x4xf32> to vector<32x2xf32>
    %196 = vector.extract_strided_slice %194 {offsets = [0, 1], sizes = [32, 2], strides = [1, 1]} : vector<32x4xf32> to vector<32x2xf32>
    %197 = vector.extract_strided_slice %194 {offsets = [0, 2], sizes = [32, 2], strides = [1, 1]} : vector<32x4xf32> to vector<32x2xf32>
    %198 = tpu.concatenate %195, %196, %197 in 0 : vector<32x2xf32>, vector<32x2xf32>, vector<32x2xf32> -> vector<96x2xf32>
    %c11 = arith.constant 11 : index
    %c0_101 = arith.constant 0 : index
    %c0_102 = arith.constant 0 : index
    %199 = vector.load %arg2[%c11, %c0_101, %c0_102] : memref<13x32x128xf32, #tpu.memory_space<vmem>>, vector<1x32x128xf32>
    %200 = vector.shape_cast %199 : vector<1x32x128xf32> to vector<32x128xf32>
    %201 = vector.extract_strided_slice %200 {offsets = [0, 0], sizes = [16, 96], strides = [1, 1]} : vector<32x128xf32> to vector<16x96xf32>
    %c11_103 = arith.constant 11 : index
    %c0_104 = arith.constant 0 : index
    %c0_105 = arith.constant 0 : index
    %202 = vector.load %arg3[%c11_103, %c0_104, %c0_105] : memref<13x32x1xf32, #tpu.memory_space<vmem>>, vector<1x32x1xf32>
    %203 = vector.shape_cast %202 : vector<1x32x1xf32> to vector<32x1xf32>
    %204 = vector.extract_strided_slice %203 {offsets = [0, 0], sizes = [16, 1], strides = [1, 1]} : vector<32x1xf32> to vector<16x1xf32>
    %cst_106 = arith.constant dense<0.000000e+00> : vector<16x2xf32>
    %205 = tpu.matmul %201, %198, %cst_106 {dimension_numbers = #tpu.dot_dimension_numbers<[1], [0], [0], [1], [0, 0, 1, 1], [], []>} : vector<16x96xf32>, vector<96x2xf32>, vector<16x2xf32> -> vector<16x2xf32>
    %206 = vector.broadcast %204 : vector<16x1xf32> to vector<16x2xf32>
    %207 = arith.addf %205, %206 : vector<16x2xf32>
    %cst_107 = arith.constant 0.000000e+00 : f32
    %208 = vector.broadcast %cst_107 : f32 to vector<16x2xf32>
    %209 = arith.maximumf %207, %208 : vector<16x2xf32>
    %210 = vector.extract_strided_slice %209 {offsets = [0, 0], sizes = [16, 2], strides = [1, 1]} : vector<16x2xf32> to vector<16x2xf32>
    %c12 = arith.constant 12 : index
    %c0_108 = arith.constant 0 : index
    %c0_109 = arith.constant 0 : index
    %211 = vector.load %arg2[%c12, %c0_108, %c0_109] : memref<13x32x128xf32, #tpu.memory_space<vmem>>, vector<1x32x128xf32>
    %212 = vector.shape_cast %211 : vector<1x32x128xf32> to vector<32x128xf32>
    %213 = vector.extract_strided_slice %212 {offsets = [0, 0], sizes = [32, 16], strides = [1, 1]} : vector<32x128xf32> to vector<32x16xf32>
    %c12_110 = arith.constant 12 : index
    %c0_111 = arith.constant 0 : index
    %c0_112 = arith.constant 0 : index
    %214 = vector.load %arg3[%c12_110, %c0_111, %c0_112] : memref<13x32x1xf32, #tpu.memory_space<vmem>>, vector<1x32x1xf32>
    %215 = vector.shape_cast %214 : vector<1x32x1xf32> to vector<32x1xf32>
    %216 = vector.extract_strided_slice %215 {offsets = [0, 0], sizes = [32, 1], strides = [1, 1]} : vector<32x1xf32> to vector<32x1xf32>
    %cst_113 = arith.constant dense<0.000000e+00> : vector<32x2xf32>
    %217 = tpu.matmul %213, %210, %cst_113 {dimension_numbers = #tpu.dot_dimension_numbers<[1], [0], [0], [1], [0, 0, 1, 1], [], []>} : vector<32x16xf32>, vector<16x2xf32>, vector<32x2xf32> -> vector<32x2xf32>
    %218 = vector.broadcast %216 : vector<32x1xf32> to vector<32x2xf32>
    %219 = arith.addf %217, %218 : vector<32x2xf32>
    %220 = arith.addf %219, %190 : vector<32x2xf32>
    %cst_114 = arith.constant 0.000000e+00 : f32
    %221 = vector.broadcast %cst_114 : f32 to vector<32x2xf32>
    %222 = arith.maximumf %220, %221 : vector<32x2xf32>
    %cst_115 = arith.constant 0.000000e+00 : f32
    %223 = vector.broadcast %cst_115 : f32 to vector<32x110xf32>
    %224 = tpu.concatenate %88, %135, %222, %223 in 1 : vector<32x8xf32>, vector<32x8xf32>, vector<32x2xf32>, vector<32x110xf32> -> vector<32x128xf32>
    %c0_116 = arith.constant 0 : index
    %c0_117 = arith.constant 0 : index
    %c0_118 = arith.constant 0 : index
    %225 = vector.load %arg5[%c0_116, %c0_117, %c0_118] : memref<1x32x128xf32, #tpu.memory_space<vmem>>, vector<1x32x128xf32>
    %226 = vector.shape_cast %225 : vector<1x32x128xf32> to vector<32x128xf32>
    %227 = vector.shape_cast %224 : vector<32x128xf32> to vector<1x32x128xf32>
    tpu.vector_store %arg5[%c0_116, %c0_117, %c0_118], %227 {strides = array<i32>} : memref<1x32x128xf32, #tpu.memory_space<vmem>>, vector<1x32x128xf32>,
    return
  }
  func.func @transform_0(%arg0: i32) -> (i32, i32, i32) {
    %c0_i32 = arith.constant 0 : i32
    %c0_i32_0 = arith.constant 0 : i32
    %c0_i32_1 = arith.constant 0 : i32
    return %arg0, %c0_i32, %c0_i32_0 : i32, i32, i32
  }
  func.func @transform_1(%arg0: i32) -> (i32, i32, i32) {
    %c0_i32 = arith.constant 0 : i32
    %c0_i32_0 = arith.constant 0 : i32
    %c0_i32_1 = arith.constant 0 : i32
    %c0_i32_2 = arith.constant 0 : i32
    return %c0_i32, %c0_i32_0, %c0_i32_1 : i32, i32, i32
  }
  func.func @transform_2(%arg0: i32) -> (i32, i32, i32) {
    %c0_i32 = arith.constant 0 : i32
    %c0_i32_0 = arith.constant 0 : i32
    %c0_i32_1 = arith.constant 0 : i32
    %c0_i32_2 = arith.constant 0 : i32
    return %c0_i32, %c0_i32_0, %c0_i32_1 : i32, i32, i32
  }
  func.func @transform_3(%arg0: i32) -> (i32, i32, i32) {
    %c0_i32 = arith.constant 0 : i32
    %c0_i32_0 = arith.constant 0 : i32
    %c0_i32_1 = arith.constant 0 : i32
    %c0_i32_2 = arith.constant 0 : i32
    return %c0_i32, %c0_i32_0, %c0_i32_1 : i32, i32, i32
  }
  func.func @transform_4(%arg0: i32) -> (i32, i32, i32) {
    %c0_i32 = arith.constant 0 : i32
    %c0_i32_0 = arith.constant 0 : i32
    %c0_i32_1 = arith.constant 0 : i32
    return %arg0, %c0_i32, %c0_i32_0 : i32, i32, i32
  }
}

</mosaic_0001>

<bundles_post_ra>
// kernel: forward.1
= control target key start
LH: loop header
LB: loop body
LE: loop exit
PB: predicated region body
PF: predicated region fallthrough
CT: control target
= control target key end

     0   :  { %9 = vsyncpa [#allocation3], 0  ;;  %s4728_s0 = inlined_call_operand.hbm [shape: f32[2,4,32], index: 0, kind: input, shape index: {}]   ;;  %s4729_s1 = inlined_call_operand.hbm [shape: f32[13,32,128], index: 1, kind: input, shape index: {}]   ;;  %s4730_s2 = inlined_call_operand.hbm [shape: f32[13,32,1], index: 2, kind: input, shape index: {}]   ;;  %s4731_s3 = inlined_call_operand.hbm [shape: f32[4,32,128], index: 3, kind: input, shape index: {}]   ;;  %s4732_s4 = inlined_call_operand.vmem [shape: f32[2,32,128], index: 4, kind: output, shape index: {}]  }
   0x1   :  { %11 = vsyncpa [#allocation3 + $0x1], 0 }
   0x2   :  { %12 = vsyncpa [#allocation5], 0 }
   0x3   :  { %13 = vsyncpa [#allocation8], 0  ;;  %s4198_s15 = smov 0   ;;  %s4200_s16 = smov 0  }
   0x4   :  { %s4202_s17 = smov 0   ;;  %s4204_s18 = smov 0  }
   0x5 LB: > { %s4217_s19 = sadd.s32 4294967295, %s4148_s18   ;;  %p39_p0 = scmp.ne.s32.totalorder %s4140_s16, %s4136_s15  ;;  %s4148_s18 = sphi %s4204_s18, %s4754_s18   ;;  %s4144_s17 = sphi %s4202_s17, %s4753_s17   ;;  %s4140_s16 = sphi %s4200_s16, %s4752_s16   ;;  %s4136_s15 = sphi %s4198_s15, %s4751_s15  }
   0x6   : > { %p4733_p1 = scmp.eq.s32.totalorder %s4217_s19, 0  ;;  %p2760_p2 = scmp.ge.s32.totalorder %s4148_s18, 1 }
   0x7   : > { %p139_p3 = scmp.lt.s32.totalorder %s4148_s18, 3  ;;  %s4150_s22 = smov [#allocation4]  }
   0x8   : > { %p4225_p4 = por %p4733_p1, %p39_p0  ;;  %s151_s23 = sshll.u32 %s4150_s22, 4  ;;  %s4233_s23 = int_to_ptr.vmem [resolvable:$true] %s151_s23 }
   0x9   : > { %p4229_p5 = pnand %p2760_p2, %p139_p3  ;;  %s4151_s25 = smov [#allocation6]  }
   0xa   : > { %s4736_s20 = scalar_select %p4225_p4, 1, 0 }
   0xb   : > { %s4737_s21 = scalar_select %p4229_p5, 1, 0 }
   0xc   : > { %p3660_p6 = pneg %p4229_p5  ;;  %s164_s26 = sshll.u32 %s4151_s25, 4  ;;  %s4243_s26 = int_to_ptr.vmem [resolvable:$true] %s164_s26 }
   0xd   : > { %s4152_s27 = smov [#allocation7]   ;;  %s3992_s5 = scalar_lea.hbm %s4729_s1, 6656 }
   0xe   : > { %p4239_p7 = pnand %p3660_p6, %p4733_p1  ;;  %s4245_s28 = sshll.u32 %s4152_s27, 4  ;;  %s178_s28 = int_to_ptr.vmem [resolvable:$true] %s4245_s28 }
   0xf   : > { %p3993_p8 = scmp.ne.s32.totalorder %s4729_s1, %s3992_s5  ;;  %p3999_p12 = scmp.lt.u32.totalorder %s3992_s5, %s4729_s1 }
  0x10   : > { %p4255_p9 = pneg %p4239_p7 }
  0x12   : > { %p3995_p10 = pnand %p4255_p9, %p3993_p8 }
  0x14   : > { %p3996_p11 = pneg %p3995_p10 }
  0x16   : > { %p4001_p13 = pnand %p3999_p12, %p3996_p11 }
  0x18   : > { %4004 = shalt.err (!%p4001_p13)
}
  0x19   : > { %s4005_s11 = scalar_lea.vmem %s4233_s23, 6656  ;;  %p4013_p6 = scmp.lt.s32.totalorder %s4233_s23, %s4233_s23 }
  0x1a   : > { %p4006_p0 = scmp.ne.s32.totalorder %s4233_s23, %s4005_s11  ;;  %p4014_p1 = scmp.lt.s32.totalorder %s4005_s11, %s4005_s11 }
  0x1c   : > { %p4008_p2 = pnand %p4006_p0, %p4255_p9  ;;  %p4015_p8 = por %p4014_p1, %p4013_p6 }
  0x1e   : > { %p4009_p3 = pneg %p4008_p2 }
  0x20   : > { %p4016_p10 = pnand %p4015_p8, %p4009_p3 }
  0x22   : > { %4019 = shalt.err (!%p4016_p10)
}
  0x23   : > { %s4153_s12 = smov 128   ;;  %s4154_s13 = smov 8  }
  0x24   : > { %3663 = dma.hbm_to_vmem [thread:$0]  (!%p4239_p7), %s4729_s1, 6656, %s4233_s23, [#allocation5], %s4153_s12, %s4153_s12, %s4154_s13  }
  0x25   : > { %s4020_s27 = scalar_lea.hbm %s4730_s2, 6656 }
  0x26   : > { %p4021_p1 = scmp.ne.s32.totalorder %s4730_s2, %s4020_s27  ;;  %p4027_p13 = scmp.lt.u32.totalorder %s4020_s27, %s4730_s2 }
  0x28   : > { %p4023_p11 = pnand %p4021_p1, %p4255_p9 }
  0x2a   : > { %p4024_p12 = pneg %p4023_p11 }
  0x2c   : > { %p4029_p0 = pnand %p4027_p13, %p4024_p12 }
  0x2e   : > { %4032 = shalt.err (!%p4029_p0)
}
  0x2f   : > { %s4033_s23 = scalar_lea.vmem %s4243_s26, 6656  ;;  %p4041_p8 = scmp.lt.s32.totalorder %s4243_s26, %s4243_s26 }
  0x30   : > { %p4034_p2 = scmp.ne.s32.totalorder %s4243_s26, %s4033_s23  ;;  %p4042_p10 = scmp.lt.s32.totalorder %s4033_s23, %s4033_s23 }
  0x32   : > { %p4036_p3 = pnand %p4034_p2, %p4255_p9  ;;  %p4043_p1 = por %p4042_p10, %p4041_p8 }
  0x34   : > { %p4037_p6 = pneg %p4036_p3 }
  0x36   : > { %p4044_p11 = pnand %p4043_p1, %p4037_p6 }
  0x38   : > { %4047 = shalt.err (!%p4044_p11)
}
  0x39   : > { %3666 = dma.hbm_to_vmem [thread:$0]  (!%p4239_p7), %s4730_s2, 6656, %s4243_s26, [#allocation5], %s4153_s12, %s4153_s12, %s4154_s13  }
  0x3a   : > { %s4048_s14 = scalar_lea.hbm %s4731_s3, 2048 }
  0x3b   : > { %p4049_p12 = scmp.ne.s32.totalorder %s4731_s3, %s4048_s14  ;;  %p4055_p2 = scmp.lt.u32.totalorder %s4048_s14, %s4731_s3 }
  0x3d   : > { %p4051_p13 = pnand %p4049_p12, %p4255_p9 }
  0x3f   : > { %p4052_p0 = pneg %p4051_p13 }
  0x41   : > { %p4057_p3 = pnand %p4055_p2, %p4052_p0 }
  0x43   : > { %4060 = shalt.err (!%p4057_p3)
}
  0x44   : > { %s4061_s29 = scalar_lea.vmem %s178_s28, 2048  ;;  %p4069_p1 = scmp.lt.s32.totalorder %s178_s28, %s178_s28 }
  0x45   : > { %p4062_p6 = scmp.ne.s32.totalorder %s178_s28, %s4061_s29  ;;  %p4070_p11 = scmp.lt.s32.totalorder %s4061_s29, %s4061_s29 }
  0x47   : > { %p4064_p8 = pnand %p4062_p6, %p4255_p9  ;;  %p4071_p4 = por %p4070_p11, %p4069_p1 }
  0x49   : > { %p4065_p10 = pneg %p4064_p8 }
  0x4b   : > { %p4072_p5 = pnand %p4071_p4, %p4065_p10 }
  0x4d   : > { %4075 = shalt.err (!%p4072_p5)
}
  0x4e   : > { %3669 = dma.hbm_to_vmem [thread:$0]  (!%p4239_p7), %s4731_s3, 2048, %s178_s28, [#allocation8], %s4153_s12, %s4153_s12, %s4154_s13  }
  0x4f   : > { %s4328_s8 = sadd.s32 1, %s4148_s18   ;;  %s26_s5 = sadd.s32 1, %s4144_s17 }
  0x50   : > { %s23_s24 = ssub.s32 %s4148_s18, %s4328_s8  ;;  %p33_p5 = scmp.ne.s32.totalorder %s4144_s17, %s4140_s16 }
  0x51   : > { %p24_p4 = scmp.eq.s32.totalorder %s23_s24, 0  ;;  %p34_p9 = scmp.eq.s32.totalorder %s4148_s18, 0 }
  0x52   : > { %p3677_p12 = scmp.lt.s32.totalorder %s4148_s18, 2  ;;  %s191_s23 = sand.u32 1, %s4144_s17  }
  0x53   : > { %s4338_s6 = scalar_select %p24_p4, %s4144_s17, %s26_s5  }
  0x54   : > { %p35_p13 = por %p34_p9, %p33_p5  ;;  %s2765_s7 = sshll.u32 %s191_s23, 2 }
  0x55   : > { %s2766_s9 = sshll.u32 %s4148_s18, 6  ;;  %s195_s28 = scalar_lea.vmem [#allocation2], %s2765_s7 }
  0x56   : > { %s4345_s14 = scalar_lea.hbm %s4728_s0, %s2766_s9  ;;  %s202_s12 = sshll.u32 %s195_s28, 4  ;;  %s4347_s12 = int_to_ptr.vmem [resolvable:$true] %s202_s12 }
  0x57   : > { %p4349_p7 = pnand %p3677_p12, %p35_p13  ;;  %s192_s18 = scalar_lea.sflag [#allocation3], %s191_s23 }
  0x58   : > { %s4076_s15 = scalar_lea.hbm %s4345_s14, 64  ;;  %s4081_s27 = scalar_lea.hbm %s4728_s0, 128 }
  0x59   : > { %p4077_p0 = scmp.ne.s32.totalorder %s4345_s14, %s4076_s15  ;;  %p4078_p2 = pneg %p4349_p7 }
  0x5a   : > { %p4082_p8 = scmp.lt.u32.totalorder %s4345_s14, %s4728_s0  ;;  %p4083_p10 = scmp.lt.u32.totalorder %s4081_s27, %s4076_s15 }
  0x5b   : > { %p4079_p3 = pnand %p4078_p2, %p4077_p0  ;;  %p4085_p11 = scmp.lt.u32.totalorder %s4076_s15, %s4345_s14 }
  0x5c   : > { %p4084_p1 = por %p4083_p10, %p4082_p8 }
  0x5d   : > { %p4080_p6 = pneg %p4079_p3 }
  0x5e   : > { %p4086_p4 = por %p4085_p11, %p4084_p1 }
  0x60   : > { %p4087_p5 = pnand %p4086_p4, %p4080_p6 }
  0x62   : > { %4090 = shalt.err (!%p4087_p5)
}
  0x63   : > { %s4091_s30 = scalar_lea.vmem %s4347_s12, 64  ;;  %s4155_s24 = smov [#allocation2]  }
  0x64   : > { %p4092_p9 = scmp.ne.s32.totalorder %s4347_s12, %s4091_s30  ;;  %s4096_s5 = sshll.u32 %s4155_s24, 4  ;;  %s4097_s5 = int_to_ptr.vmem [resolvable:$false] %s4096_s5 }
  0x65   : > { %s4098_s23 = scalar_lea.vmem %s4097_s5, 128  ;;  %p4099_p0 = scmp.lt.s32.totalorder %s4347_s12, %s4097_s5 }
  0x66   : > { %p4094_p12 = pnand %p4092_p9, %p4078_p2  ;;  %p4100_p3 = scmp.lt.s32.totalorder %s4098_s23, %s4091_s30 }
  0x68   : > { %p4095_p13 = pneg %p4094_p12  ;;  %p4101_p8 = por %p4100_p3, %p4099_p0 }
  0x6a   : > { %p4102_p10 = pnand %p4101_p8, %p4095_p13 }
  0x6c   : > { %4105 = shalt.err (!%p4102_p10)
}
  0x6d   : > { %3673 = dma.hbm_to_vmem [thread:$0]  (!%p4349_p7), %s4345_s14, 64, %s4347_s12, %s192_s18  }
  0x6e   : > { %p4741_p6 = scmp.ne.s32.totalorder %s4737_s21, 0 }
  0x6f   : > { %s213_s7 = sand.u32 (!%p4741_p6), 1, %s4140_s16   ;;  %p4742_p2 = scmp.ne.s32.totalorder (!%p4741_p6), %s4736_s20, 0 }
  0x70   : > { %211 = sbr.rel (%p4741_p6) target bundleno = 6056 (0x17a8), region = 36  ;;  %s2768_s9 = sshll.u32 (!%p4741_p6), %s213_s7, 2 }
  0x71   : > { %s214_s10 = scalar_lea.sflag (!%p4741_p6), [#allocation3], %s213_s7  ;;  %s217_s11 = scalar_lea.vmem (!%p4741_p6), [#allocation2], %s2768_s9 }
  0x77   : > { %4123 = dma.done.wait (%p4742_p2), %s214_s10, 64  }
  0x78   : > { %4125 = vsyncadd (%p4742_p2), %s214_s10, 4294967232  ;;  %p4743_p1 = scmp.eq.s32.totalorder %s4217_s19, 0 }
  0x7a   : > { %4127 = dma.done.wait (%p4743_p1), [#allocation5], 13312   ;;  %p4744_p11 = pmov %p4743_p1 }
  0x7b   : > { %p4745_p7 = pmov %p4743_p1 }
  0x7c   : > { %4129 = vsyncadd (%p4744_p11), [#allocation5], 4294953984 }
  0x7d   : > { %4131 = dma.done.wait (%p4745_p7), [#allocation8], 2048   ;;  %p4746_p4 = pmov %p4743_p1 }
  0x7e   : > { %v4156_v0 = vmov 0.0|0.0   ;;  %vm4157_vm0 = vmmov 0   ;;  %v4158_v1 = vmov 0.0   ;;  %v260_v2 = vld [vmem:[#allocation7] sm:$0xff]  ;;  %v261_v3 = vld [vmem:[#allocation7 + $0x8] sm:$0xff]  ;;  %v262_v4 = vld [vmem:[#allocation7 + $0x10] sm:$0xff] }
  0x7f   : > { %4133 = vsyncadd (%p4746_p4), [#allocation8], 4294965248  ;;  %3372 = vmatprep.subr.bf16.mxu0 %v4156_v0  ;;  %3040 = vmatprep.mubr.msk.f32.mxu0 %vm4157_vm0, %v4158_v1  ;;  %v3373_v5 = vpack.c.bf16 %v261_v3, %v260_v2  ;;  %v263_v6 = vld [vmem:[#allocation7 + $0x18] sm:$0xff]  ;;  %vm264_vm1 = vcmask 261120   ;;  %v352_v9 = vld [vmem:[#allocation4] sm:$0xff]  ;;  %vm366_vm2 = vcmask 130048  }
  0x80   : > { %v3376_v7 = vpack.c.bf16 %v263_v6, %v262_v4  ;;  %v259_v8 = vld [vmem:[%s217_s11] sm:$0xf]  ;;  %3047 = vmatprep.mubr.msk.f32.mxu1 %vm366_vm2, %v352_v9  ;;  %v4159_v13 = vmov 0   ;;  %s4160_s20 = smov 80   ;;  %s4161_s21 = smov 112   ;;  %v354_v14 = vld [vmem:[#allocation6] sm:$0xff] }
  0x81   : > { %3374 = vmatpush3.bf16.msra.mxu0 %v3373_v5  ;;  %3736 = vset.pattern.permute.xlu0 %v4159_v13  ;;  %s4162_s14 = smov 96   ;;  %v355_v15 = vld [vmem:[#allocation6 + $0x8] sm:$0xff]  ;;  %vm349_vm3 = vcmask 1043456   ;;  %v451_v23 = vld [vmem:[#allocation7 + $0x20] sm:$0xff]  ;;  %s4163_s28 = smov 104   ;;  %vm584_vm4 = vcmask 523264  }
  0x82   : > { %3375 = vmatprep.subr.bf16.mxu0 %v4156_v0  ;;  %3735 = vset.pattern.permute.xlu1 %v4159_v13  ;;  %v353_v22 = vld [vmem:[#allocation4 + $0x8] sm:$0xff]  ;;  %s4164_s12 = smov 120   ;;  %v555_v38 = vld [vmem:[#allocation4 + $0x20] sm:$0xff]  ;;  %v563_v40 = vld [vmem:[#allocation6 + $0x38] sm:$0xff]  ;;  %s4165_s13 = smov 1   ;;  %vm702_vm5 = vcmask 7168  }
  0x83   : > { %v452_v24 = vld [vmem:[#allocation7 + $0x28] sm:$0xff]  ;;  %v560_v41 = vld [vmem:[#allocation6 + $0x20] sm:$0xff]  ;;  %v562_v42 = vld [vmem:[#allocation6 + $0x30] sm:$0xff]  ;;  %vm707_vm6 = vcmask 72704   ;;  %s4166_s18 = smov 127   ;;  %vm770_vm8 = vcmask 785408  }
  0x84   : > { %v3382_v25 = vpack.c.bf16 %v452_v24, %v451_v23  ;;  %v561_v39 = vld [vmem:[#allocation6 + $0x28] sm:$0xff]  ;;  %v557_v56 = vld [vmem:[#allocation4 + $0x30] sm:$0xff]  ;;  %v558_v57 = vld [vmem:[#allocation4 + $0x38] sm:$0xff]  ;;  %s4167_s15 = smov 126   ;;  %vm1629_vm9 = vcmask 64512   ;;  %s4168_s22 = smov 124  }
  0x85   : > { %3377 = vmatpush3.bf16.msra.mxu0 %v3376_v7  ;;  %v556_v55 = vld [vmem:[#allocation4 + $0x28] sm:$0xff]  ;;  %vm4412_vm7 = vmpackc.low %vm707_vm6, %vm707_vm6  ;;  %s4169_s25 = smov 116   ;;  %vm1888_vm10 = vcmask 31744   ;;  %s4170_s27 = smov 122   ;;  %vm2168_vm11 = vcmask 23552   ;;  %vm2654_vm13 = vcmask 146432  }
  0x86   : > { %vm4612_vm12 = vmpackc.low %vm2168_vm11, %vm2168_vm11  ;;  %s4171_s29 = smov 8   ;;  %s4172_s26 = smov 16  }
  0x87   : > { %p254_p5 = scmp.lt.s32.totalorder %s4217_s19, 1 }
  0x88   : > { %3041 = vmatmul.mubr.msk.f32.vlgmr.msra.gmra.mrb[0].mxu0 %vm264_vm1, %v259_v8 }
  0x89   : > { %3073 = vmatprep.mubr.msk.f32.mxu0 %vm584_vm4, %v555_v38  ;;  %s4756_s19 = smov (!%p254_p5, %s4217_s19), 1 }
  0x8a   : > { %s2848_s30 = sshll.u32 %s4756_s19, 5 }
  0x8b   : > { %s258_s23 = scalar_lea.vmem %s4732_s4, %s2848_s30 }
 0x15b   : > { %v334_v10 = vpop.f32.mrb[0].mxu0 }
 0x15c   : > { %v3042_v11 = vpop.f32.mrb[1].mxu0  ;;  %v339_v12 = vrot.slane %v334_v10, 4 }
 0x15e   : > { %346 = vrot.lane.b32.xlu1 %v339_v12, %s4160_s20  ;;  %340 = vrot.lane.b32.xlu0 %v339_v12, %s4161_s21 }
 0x162   : > { %343 = vrot.lane.b32.xlu0 %v334_v10, %s4162_s14  ;;  %358 = vperm.xlu1 %3735, %v354_v14  }
 0x166   : > { %363 = vperm.xlu0 %3736, %v355_v15  }
 0x1d0   : > { %v341_v16 = vpop.permute.xlu0 %340  ;;  %v347_v17 = vpop.permute.xlu1 %346 }
 0x1d1   : > { %v350_v19 = vsel %vm349_vm3, %v334_v10, %v341_v16 }
 0x1d4   : > { %v344_v18 = vpop.permute.xlu0 %343 }
 0x1d5   : > { %v351_v20 = vsel %vm349_vm3, %v344_v18, %v347_v17 }
 0x1d6   : > { %v3378_v21 = vpack.c.bf16 %v351_v20, %v350_v19 }
 0x1d8   : > { %3379 = vmatprep.subr.bf16.mxu1 %v3378_v21 }
 0x1d9   : > { %3381 = vmatpush3.bf16.msra.mxu1 %v3378_v21 }
 0x1da   : > { %3383 = vmatprep.subr.bf16.mxu1 %v3382_v25 }
 0x1dc   : > { %3048 = vmatmul.mubr.msk.f32.vlgmr.msra.gmra.mrb[0].mxu1 %vm366_vm2, %v353_v22 }
 0x1dd   : > { %3385 = vmatpush3.bf16.msra.mxu1 %v3382_v25 }
 0x1e1   : > { %v359_v27 = vpop.permute.xlu1 %358 }
 0x1e5   : > { %v364_v26 = vpop.permute.xlu0 %363 }
 0x2af   : > { %v3049_v28 = vpop.f32.mrb[0].mxu1 }
 0x2b0   : > { %v445_v29 = vadd.f32 %v3049_v28, %v364_v26  ;;  %v439_v30 = vpop.f32.mrb[1].mxu1 }
 0x2b1   : > { %v440_v31 = vadd.f32 %v439_v30, %v359_v27 }
 0x2b2   : > { %v449_v33 = vmax.f32 %v445_v29, 0.0 }
 0x2b3   : > { %v448_v32 = vmax.f32 %v440_v31, 0.0  ;;  %v741_v31 = vld [vmem:[#allocation4 + $0x40] sm:$0xff] }
 0x2b5   : > { %3054 = vmatprep.mubr.msk.f32.mxu1 %vm366_vm2, %v448_v32  ;;  %v746_v32 = vld [vmem:[#allocation6 + $0x40] sm:$0xff] }
 0x2b6   : > { %3055 = vmatmul.mubr.msk.f32.vlgmr.msra.gmra.mrb[2].mxu1 %vm366_vm2, %v449_v33  ;;  %v747_v33 = vld [vmem:[#allocation6 + $0x48] sm:$0xff] }
 0x2b7   : > { %3103 = vmatprep.mubr.msk.f32.mxu1 %vm770_vm8, %v741_v31  ;;  %v1029_v31 = vld [vmem:[#allocation6 + $0x80] sm:$0xff] }
 0x389   : > { %v3056_v34 = vpop.f32.mrb[2].mxu1 }
 0x38a   : > { %v525_v35 = vpop.f32.mrb[3].mxu1 }
 0x38b   : > { %v3747_v36 = vpack.i.bf16 %v3056_v34, %v525_v35  ;;  %v3386_v37 = vpack.c.bf16 %v3056_v34, %v525_v35  ;;  %v748_v34 = vld [vmem:[#allocation6 + $0x50] sm:$0xff]  ;;  %v749_v35 = vld [vmem:[#allocation6 + $0x58] sm:$0xff] }
 0x38d   : > { %3748 = vrot.lane.b32.xlu0 %v3747_v36, %s4163_s28  ;;  %3738 = vrot.lane.b32.xlu1 %v3747_v36, %s4164_s12 }
 0x38e   : > { %3387 = vmatprep.subr.bf16.mxu0 %v3386_v37 }
 0x38f   : > { %3389 = vmatpush3.bf16.msra.mxu0 %v3386_v37 }
 0x391   : > { %571 = vperm.xlu0 %3736, %v561_v39   ;;  %3743 = vrot.lane.b32.xlu1 %v3747_v36, %s4161_s21 }
 0x395   : > { %581 = vperm.xlu0 %3736, %v563_v40   ;;  %566 = vperm.xlu1 %3735, %v560_v41  }
 0x399   : > { %576 = vperm.xlu1 %3735, %v562_v42  }
 0x3ff   : > { %v3739_v43 = vpop.permute.xlu1 %3738  ;;  %v3749_v46 = vpop.permute.xlu0 %3748 }
 0x400   : > { %v3741_v44 = vunpack.i.h.bf16 %v3739_v43  ;;  %v3740_v45 = vunpack.i.l.bf16 %v3739_v43  ;;  %v3751_v49 = vunpack.i.h.bf16 %v3749_v46  ;;  %v3750_v50 = vunpack.i.l.bf16 %v3749_v46 }
 0x402   : > { %v3390_v47 = vpack.c.bf16 %v3741_v44, %v3740_v45  ;;  %v3398_v54 = vpack.c.bf16 %v3751_v49, %v3750_v50 }
 0x403   : > { %v3744_v48 = vpop.permute.xlu1 %3743 }
 0x404   : > { %v3746_v51 = vunpack.i.h.bf16 %v3744_v48  ;;  %v3745_v52 = vunpack.i.l.bf16 %v3744_v48  ;;  %3391 = vmatprep.subr.bf16.mxu0 %v3390_v47 }
 0x405   : > { %3393 = vmatpush3.bf16.msra.mxu0 %v3390_v47 }
 0x406   : > { %v3394_v53 = vpack.c.bf16 %v3746_v51, %v3745_v52  ;;  %v742_v52 = vld [vmem:[#allocation4 + $0x48] sm:$0xff] }
 0x408   : > { %3395 = vmatprep.subr.bf16.mxu0 %v3394_v53 }
 0x409   : > { %3397 = vmatpush3.bf16.msra.mxu0 %v3394_v53  ;;  %v743_v53 = vld [vmem:[#allocation4 + $0x50] sm:$0xff] }
 0x40a   : > { %3399 = vmatprep.subr.bf16.mxu0 %v3398_v54 }
 0x40d   : > { %3401 = vmatpush3.bf16.msra.mxu0 %v3398_v54  ;;  %v744_v54 = vld [vmem:[#allocation4 + $0x58] sm:$0xff] }
 0x410   : > { %3074 = vmatmul.mubr.msk.f32.vlgmr.msra.gmra.mrb[2].mxu0 %vm584_vm4, %v556_v55  ;;  %v572_v58 = vpop.permute.xlu0 %571 }
 0x411   : > { %3076 = vmatprep.mubr.msk.f32.mxu0 %vm584_vm4, %v557_v56 }
 0x414   : > { %3077 = vmatmul.mubr.msk.f32.gmra.mrb[4].mxu0 %vm584_vm4, %v558_v57  ;;  %v567_v59 = vpop.permute.xlu1 %566  ;;  %v582_v1 = vpop.permute.xlu0 %581 }
 0x418   : > { %v577_v4 = vpop.permute.xlu1 %576 }
 0x4e3   : > { %v3075_v60 = vpop.f32.mrb[2].mxu0 }
 0x4e4   : > { %v669_v61 = vadd.f32 %v3075_v60, %v572_v58  ;;  %v663_v62 = vpop.f32.mrb[3].mxu0 }
 0x4e5   : > { %v664_v63 = vadd.f32 %v663_v62, %v567_v59 }
 0x4e6   : > { %v683_v0 = vmax.f32 %v669_v61, 0.0 }
 0x4e7   : > { %v682_v2 = vmax.f32 %v664_v63, 0.0  ;;  %v3078_v3 = vpop.f32.mrb[4].mxu0 }
 0x4e8   : > { %v679_v5 = vadd.f32 %v3078_v3, %v582_v1  ;;  %v673_v6 = vpop.f32.mrb[5].mxu0 }
 0x4e9   : > { %v3752_v7 = vpack.i.bf16 %v683_v0, %v682_v2  ;;  %v674_v8 = vadd.f32 %v673_v6, %v577_v4 }
 0x4ea   : > { %v685_v9 = vmax.f32 %v679_v5, 0.0 }
 0x4eb   : > { %v684_v10 = vmax.f32 %v674_v8, 0.0  ;;  %3753 = vrot.lane.b32.xlu1 %v3752_v7, %s4165_s13 }
 0x4ed   : > { %v3757_v11 = vpack.i.bf16 %v685_v9, %v684_v10 }
 0x4ef   : > { %3758 = vrot.lane.b32.xlu0 %v3757_v11, %s4165_s13 }
 0x55d   : > { %v3754_v12 = vpop.permute.xlu1 %3753 }
 0x55e   : > { %v3756_v13 = vunpack.i.h.bf16 %v3754_v12  ;;  %v3755_v14 = vunpack.i.l.bf16 %v3754_v12 }
 0x560   : > { %v704_v15 = vsel %vm702_vm5, 0.0, %v3756_v13  ;;  %v703_v16 = vsel %vm702_vm5, 0.0, %v3755_v14 }
 0x561   : > { %v709_v18 = vsel %vm707_vm6, %v704_v15, 0.0  ;;  %v708_v19 = vsel %vm707_vm6, %v703_v16, 0.0  ;;  %v3402_v20 = vpack.c.bf16 %v704_v15, %v703_v16  ;;  %v3759_v21 = vpop.permute.xlu0 %3758 }
 0x562   : > { %v3761_v22 = vunpack.i.h.bf16 %v3759_v21  ;;  %v3760_v23 = vunpack.i.l.bf16 %v3759_v21  ;;  %v3762_v24 = vpack.i.bf16 %v709_v18, %v708_v19 }
 0x563   : > { %3404 = vmatprep.subr.msk.bf16.mxu1 %vm4412_vm7, %v3402_v20 }
 0x564   : > { %v706_v25 = vsel %vm702_vm5, 0.0, %v3761_v22  ;;  %v705_v26 = vsel %vm702_vm5, 0.0, %v3760_v23  ;;  %3407 = vmatpush3.bf16.msk.msra.mxu1 %vm4412_vm7, %v3402_v20  ;;  %3763 = vrot.lane.b32.xlu1 %v3762_v24, %s4166_s18 }
 0x565   : > { %v711_v27 = vsel %vm707_vm6, %v706_v25, 0.0  ;;  %v710_v28 = vsel %vm707_vm6, %v705_v26, 0.0  ;;  %v3408_v29 = vpack.c.bf16 %v706_v25, %v705_v26 }
 0x566   : > { %v3767_v30 = vpack.i.bf16 %v711_v27, %v710_v28  ;;  %v925_v28 = vld [vmem:[#allocation4 + $0x60] sm:$0xff] }
 0x567   : > { %3410 = vmatprep.subr.msk.bf16.mxu1 %vm4412_vm7, %v3408_v29  ;;  %3133 = vmatprep.mubr.msk.f32.mxu0 %vm770_vm8, %v925_v28 }
 0x568   : > { %3768 = vrot.lane.b32.xlu0 %v3767_v30, %s4166_s18  ;;  %3413 = vmatpush3.bf16.msk.msra.mxu1 %vm4412_vm7, %v3408_v29  ;;  %v928_v29 = vld [vmem:[#allocation6 + $0x60] sm:$0xff] }
 0x569   : > { %3773 = vrot.lane.b32.xlu1 %v3762_v24, %s4167_s15 }
 0x56c   : > { %3778 = vrot.lane.b32.xlu0 %v3767_v30, %s4167_s15  ;;  %v929_v30 = vld [vmem:[#allocation6 + $0x68] sm:$0xff] }
 0x56d   : > { %752 = vperm.xlu1 %3735, %v746_v32   ;;  %v1030_v32 = vld [vmem:[#allocation6 + $0x88] sm:$0xff] }
 0x570   : > { %757 = vperm.xlu0 %3736, %v747_v33   ;;  %v1031_v33 = vld [vmem:[#allocation6 + $0x90] sm:$0xff] }
 0x571   : > { %762 = vperm.xlu1 %3735, %v748_v34   ;;  %v1032_v34 = vld [vmem:[#allocation6 + $0x98] sm:$0xff] }
 0x574   : > { %767 = vperm.xlu0 %3736, %v749_v35  }
 0x5d6   : > { %v3764_v36 = vpop.permute.xlu1 %3763 }
 0x5d7   : > { %v3766_v37 = vunpack.i.h.bf16 %v3764_v36  ;;  %v3765_v38 = vunpack.i.l.bf16 %v3764_v36 }
 0x5d9   : > { %v3414_v39 = vpack.c.bf16 %v3766_v37, %v3765_v38 }
 0x5da   : > { %v3769_v40 = vpop.permute.xlu0 %3768 }
 0x5db   : > { %v3771_v41 = vunpack.i.h.bf16 %v3769_v40  ;;  %v3770_v42 = vunpack.i.l.bf16 %v3769_v40  ;;  %v3774_v43 = vpop.permute.xlu1 %3773  ;;  %3415 = vmatprep.subr.bf16.mxu1 %v3414_v39 }
 0x5dc   : > { %v3776_v44 = vunpack.i.h.bf16 %v3774_v43  ;;  %v3775_v45 = vunpack.i.l.bf16 %v3774_v43  ;;  %3417 = vmatpush3.bf16.msra.mxu1 %v3414_v39 }
 0x5dd   : > { %v3418_v46 = vpack.c.bf16 %v3771_v41, %v3770_v42 }
 0x5de   : > { %v3779_v47 = vpop.permute.xlu0 %3778  ;;  %v3422_v48 = vpack.c.bf16 %v3776_v44, %v3775_v45 }
 0x5df   : > { %v3781_v49 = vunpack.i.h.bf16 %v3779_v47  ;;  %v3780_v50 = vunpack.i.l.bf16 %v3779_v47  ;;  %3419 = vmatprep.subr.bf16.mxu1 %v3418_v46 }
 0x5e0   : > { %3421 = vmatpush3.bf16.msra.mxu1 %v3418_v46 }
 0x5e1   : > { %3423 = vmatprep.subr.bf16.mxu1 %v3422_v48  ;;  %v3426_v51 = vpack.c.bf16 %v3781_v49, %v3780_v50 }
 0x5e4   : > { %3425 = vmatpush3.bf16.msra.mxu1 %v3422_v48 }
 0x5e5   : > { %3427 = vmatprep.subr.bf16.mxu1 %v3426_v51 }
 0x5e8   : > { %3429 = vmatpush3.bf16.msra.mxu1 %v3426_v51  ;;  %v926_v51 = vld [vmem:[#allocation4 + $0x68] sm:$0xff] }
 0x5eb   : > { %3104 = vmatmul.mubr.msk.f32.vlgmr.msra.gmra.mrb[4].mxu1 %vm770_vm8, %v742_v52  ;;  %v1024_v52 = vld [vmem:[#allocation4 + $0x80] sm:$0xff] }
 0x5ec   : > { %3106 = vmatprep.mubr.msk.f32.mxu1 %vm770_vm8, %v743_v53  ;;  %v753_v56 = vpop.permute.xlu1 %752 }
 0x5ef   : > { %3107 = vmatmul.mubr.msk.f32.gmra.mrb[6].mxu1 %vm770_vm8, %v744_v54  ;;  %v758_v55 = vpop.permute.xlu0 %757 }
 0x5f0   : > { %v763_v1 = vpop.permute.xlu1 %762  ;;  %3140 = vmatprep.mubr.msk.f32.mxu1 %vm366_vm2, %v1024_v52 }
 0x5f3   : > { %v768_v62 = vpop.permute.xlu0 %767 }
 0x6be   : > { %v3105_v57 = vpop.f32.mrb[4].mxu1 }
 0x6bf   : > { %v4438_v58 = vadd.f32 %v3105_v57, %v758_v55  ;;  %v849_v59 = vpop.f32.mrb[5].mxu1 }
 0x6c0   : > { %v4440_v60 = vadd.f32 %v849_v59, %v753_v56 }
 0x6c1   : > { %v869_v61 = vmax.f32 %v4438_v58, 0.0 }
 0x6c2   : > { %v868_v63 = vmax.f32 %v4440_v60, 0.0  ;;  %v3108_v0 = vpop.f32.mrb[6].mxu1 }
 0x6c3   : > { %v4444_v2 = vadd.f32 %v3108_v0, %v768_v62  ;;  %v859_v3 = vpop.f32.mrb[7].mxu1  ;;  %v1025_v0 = vld [vmem:[#allocation4 + $0x88] sm:$0xff] }
 0x6c4   : > { %v4446_v4 = vadd.f32 %v859_v3, %v763_v1  ;;  %v3782_v5 = vpack.i.bf16 %v869_v61, %v868_v63  ;;  %v1026_v1 = vld [vmem:[#allocation4 + $0x90] sm:$0xff]  ;;  %v1027_v3 = vld [vmem:[#allocation4 + $0x98] sm:$0xff] }
 0x6c5   : > { %v871_v6 = vmax.f32 %v4444_v2, 0.0 }
 0x6c6   : > { %v870_v7 = vmax.f32 %v4446_v4, 0.0  ;;  %3783 = vrot.lane.b32.xlu1 %v3782_v5, %s4165_s13 }
 0x6c8   : > { %v3787_v8 = vpack.i.bf16 %v871_v6, %v870_v7 }
 0x6ca   : > { %3788 = vrot.lane.b32.xlu0 %v3787_v8, %s4165_s13 }
 0x738   : > { %v3784_v9 = vpop.permute.xlu1 %3783 }
 0x739   : > { %v3786_v10 = vunpack.i.h.bf16 %v3784_v9  ;;  %v3785_v11 = vunpack.i.l.bf16 %v3784_v9 }
 0x73b   : > { %v889_v12 = vsel %vm702_vm5, 0.0, %v3786_v10  ;;  %v888_v13 = vsel %vm702_vm5, 0.0, %v3785_v11 }
 0x73c   : > { %v893_v14 = vsel %vm707_vm6, %v889_v12, 0.0  ;;  %v892_v15 = vsel %vm707_vm6, %v888_v13, 0.0  ;;  %v3430_v16 = vpack.c.bf16 %v889_v12, %v888_v13  ;;  %v3789_v18 = vpop.permute.xlu0 %3788 }
 0x73d   : > { %v3791_v19 = vunpack.i.h.bf16 %v3789_v18  ;;  %v3790_v20 = vunpack.i.l.bf16 %v3789_v18  ;;  %v3792_v21 = vpack.i.bf16 %v893_v14, %v892_v15 }
 0x73e   : > { %3432 = vmatprep.subr.msk.bf16.mxu0 %vm4412_vm7, %v3430_v16 }
 0x73f   : > { %v891_v22 = vsel %vm702_vm5, 0.0, %v3791_v19  ;;  %v890_v23 = vsel %vm702_vm5, 0.0, %v3790_v20  ;;  %3435 = vmatpush3.bf16.msk.msra.mxu0 %vm4412_vm7, %v3430_v16  ;;  %3793 = vrot.lane.b32.xlu1 %v3792_v21, %s4166_s18 }
 0x740   : > { %v895_v24 = vsel %vm707_vm6, %v891_v22, 0.0  ;;  %v894_v25 = vsel %vm707_vm6, %v890_v23, 0.0  ;;  %v3436_v26 = vpack.c.bf16 %v891_v22, %v890_v23 }
 0x741   : > { %v3797_v27 = vpack.i.bf16 %v895_v24, %v894_v25 }
 0x742   : > { %3438 = vmatprep.subr.msk.bf16.mxu0 %vm4412_vm7, %v3436_v26 }
 0x743   : > { %3798 = vrot.lane.b32.xlu0 %v3797_v27, %s4166_s18  ;;  %3441 = vmatpush3.bf16.msk.msra.mxu0 %vm4412_vm7, %v3436_v26 }
 0x744   : > { %3803 = vrot.lane.b32.xlu1 %v3792_v21, %s4167_s15 }
 0x747   : > { %3808 = vrot.lane.b32.xlu0 %v3797_v27, %s4167_s15 }
 0x748   : > { %932 = vperm.xlu1 %3735, %v928_v29  }
 0x74b   : > { %937 = vperm.xlu0 %3736, %v929_v30  }
 0x74c   : > { %1035 = vperm.xlu1 %3735, %v1029_v31  }
 0x74f   : > { %1040 = vperm.xlu0 %3736, %v1030_v32  }
 0x750   : > { %1045 = vperm.xlu1 %3735, %v1031_v33  }
 0x753   : > { %1050 = vperm.xlu0 %3736, %v1032_v34  }
 0x7b1   : > { %v3794_v35 = vpop.permute.xlu1 %3793 }
 0x7b2   : > { %v3796_v36 = vunpack.i.h.bf16 %v3794_v35  ;;  %v3795_v37 = vunpack.i.l.bf16 %v3794_v35 }
 0x7b4   : > { %v3442_v38 = vpack.c.bf16 %v3796_v36, %v3795_v37 }
 0x7b5   : > { %v3799_v39 = vpop.permute.xlu0 %3798 }
 0x7b6   : > { %v3801_v40 = vunpack.i.h.bf16 %v3799_v39  ;;  %v3800_v41 = vunpack.i.l.bf16 %v3799_v39  ;;  %v3804_v42 = vpop.permute.xlu1 %3803  ;;  %3443 = vmatprep.subr.bf16.mxu0 %v3442_v38 }
 0x7b7   : > { %v3806_v43 = vunpack.i.h.bf16 %v3804_v42  ;;  %v3805_v44 = vunpack.i.l.bf16 %v3804_v42  ;;  %3445 = vmatpush3.bf16.msra.mxu0 %v3442_v38  ;;  %v1211_v42 = vld [vmem:[#allocation4 + $0xa0] sm:$0xff] }
 0x7b8   : > { %v3446_v45 = vpack.c.bf16 %v3801_v40, %v3800_v41 }
 0x7b9   : > { %v3809_v46 = vpop.permute.xlu0 %3808  ;;  %v3450_v47 = vpack.c.bf16 %v3806_v43, %v3805_v44  ;;  %v1216_v43 = vld [vmem:[#allocation6 + $0xa0] sm:$0xff]  ;;  %v1217_v44 = vld [vmem:[#allocation6 + $0xa8] sm:$0xff] }
 0x7ba   : > { %v3811_v48 = vunpack.i.h.bf16 %v3809_v46  ;;  %v3810_v49 = vunpack.i.l.bf16 %v3809_v46  ;;  %3447 = vmatprep.subr.bf16.mxu0 %v3446_v45  ;;  %v1219_v46 = vld [vmem:[#allocation6 + $0xb8] sm:$0xff] }
 0x7bb   : > { %3449 = vmatpush3.bf16.msra.mxu0 %v3446_v45  ;;  %v1218_v45 = vld [vmem:[#allocation6 + $0xb0] sm:$0xff] }
 0x7bc   : > { %3451 = vmatprep.subr.bf16.mxu0 %v3450_v47  ;;  %v3454_v50 = vpack.c.bf16 %v3811_v48, %v3810_v49 }
 0x7bf   : > { %3453 = vmatpush3.bf16.msra.mxu0 %v3450_v47 }
 0x7c0   : > { %3455 = vmatprep.subr.bf16.mxu0 %v3454_v50 }
 0x7c3   : > { %3457 = vmatpush3.bf16.msra.mxu0 %v3454_v50 }
 0x7c6   : > { %3134 = vmatmul.mubr.msk.f32.vlgmr.msra.gmra.mrb[6].mxu0 %vm770_vm8, %v926_v51 }
 0x7c7   : > { %v933_v55 = vpop.permute.xlu1 %932 }
 0x7ca   : > { %v938_v53 = vpop.permute.xlu0 %937 }
 0x7cb   : > { %v1036_v6 = vpop.permute.xlu1 %1035 }
 0x7ce   : > { %v1041_v5 = vpop.permute.xlu0 %1040 }
 0x7cf   : > { %v1046_v15 = vpop.permute.xlu1 %1045 }
 0x7d2   : > { %v1051_v12 = vpop.permute.xlu0 %1050 }
 0x899   : > { %v3135_v54 = vpop.f32.mrb[6].mxu0 }
 0x89a   : > { %v1018_v56 = vadd.f32 %v3135_v54, %v938_v53  ;;  %v1012_v57 = vpop.f32.mrb[7].mxu0 }
 0x89b   : > { %v1013_v59 = vadd.f32 %v1012_v57, %v933_v55 }
 0x89c   : > { %v1022_v61 = vmax.f32 %v1018_v56, 0.0 }
 0x89d   : > { %v1021_v62 = vmax.f32 %v1013_v59, 0.0 }
 0x89f   : > { %v3458_v63 = vpack.c.bf16 %v1022_v61, %v1021_v62 }
 0x8a1   : > { %3459 = vmatprep.subr.bf16.mxu1 %v3458_v63 }
 0x8a2   : > { %3461 = vmatpush3.bf16.msra.mxu1 %v3458_v63 }
 0x8a5   : > { %3141 = vmatmul.mubr.msk.f32.vlgmr.msra.gmra.mrb[8].mxu1 %vm366_vm2, %v1025_v0 }
 0x8a6   : > { %3143 = vmatprep.mubr.msk.f32.mxu1 %vm366_vm2, %v1026_v1  ;;  %v1212_v1 = vld [vmem:[#allocation4 + $0xa8] sm:$0xff] }
 0x8a9   : > { %3144 = vmatmul.mubr.msk.f32.gmra.mrb[10].mxu1 %vm366_vm2, %v1027_v3  ;;  %v1213_v3 = vld [vmem:[#allocation4 + $0xb0] sm:$0xff] }
 0x8aa   : > { %3170 = vmatprep.mubr.msk.f32.mxu1 %vm770_vm8, %v1211_v42 }
 0x978   : > { %v3142_v7 = vpop.f32.mrb[8].mxu1 }
 0x979   : > { %v1137_v8 = vadd.f32 %v3142_v7, %v1041_v5  ;;  %v1131_v9 = vpop.f32.mrb[9].mxu1  ;;  %v1214_v5 = vld [vmem:[#allocation4 + $0xb8] sm:$0xff] }
 0x97a   : > { %v1132_v10 = vadd.f32 %v1131_v9, %v1036_v6 }
 0x97b   : > { %v4479_v11 = vadd.f32 %v1137_v8, %v4438_v58 }
 0x97c   : > { %v4482_v13 = vadd.f32 %v1132_v10, %v4440_v60  ;;  %v3145_v14 = vpop.f32.mrb[10].mxu1 }
 0x97d   : > { %v1155_v16 = vmax.f32 %v4479_v11, 0.0  ;;  %v1147_v18 = vadd.f32 %v3145_v14, %v1051_v12  ;;  %v1141_v19 = vpop.f32.mrb[11].mxu1 }
 0x97e   : > { %v1154_v20 = vmax.f32 %v4482_v13, 0.0  ;;  %v1142_v21 = vadd.f32 %v1141_v19, %v1046_v15 }
 0x97f   : > { %v4487_v22 = vadd.f32 %v1147_v18, %v4444_v2 }
 0x980   : > { %v4490_v23 = vadd.f32 %v1142_v21, %v4446_v4  ;;  %v3812_v58 = vpack.i.bf16 %v1155_v16, %v1154_v20 }
 0x981   : > { %v1157_v60 = vmax.f32 %v4487_v22, 0.0 }
 0x982   : > { %v1156_v24 = vmax.f32 %v4490_v23, 0.0  ;;  %3813 = vrot.lane.b32.xlu1 %v3812_v58, %s4165_s13 }
 0x984   : > { %v3817_v2 = vpack.i.bf16 %v1157_v60, %v1156_v24 }
 0x986   : > { %3818 = vrot.lane.b32.xlu0 %v3817_v2, %s4165_s13 }
 0x9f4   : > { %v3814_v4 = vpop.permute.xlu1 %3813 }
 0x9f5   : > { %v3816_v25 = vunpack.i.h.bf16 %v3814_v4  ;;  %v3815_v26 = vunpack.i.l.bf16 %v3814_v4 }
 0x9f7   : > { %v1175_v27 = vsel %vm702_vm5, 0.0, %v3816_v25  ;;  %v1174_v28 = vsel %vm702_vm5, 0.0, %v3815_v26 }
 0x9f8   : > { %v1179_v29 = vsel %vm707_vm6, %v1175_v27, 0.0  ;;  %v1178_v30 = vsel %vm707_vm6, %v1174_v28, 0.0  ;;  %v3462_v31 = vpack.c.bf16 %v1175_v27, %v1174_v28  ;;  %v3819_v32 = vpop.permute.xlu0 %3818 }
 0x9f9   : > { %v3821_v33 = vunpack.i.h.bf16 %v3819_v32  ;;  %v3820_v34 = vunpack.i.l.bf16 %v3819_v32  ;;  %v3822_v35 = vpack.i.bf16 %v1179_v29, %v1178_v30 }
 0x9fa   : > { %3464 = vmatprep.subr.msk.bf16.mxu1 %vm4412_vm7, %v3462_v31 }
 0x9fb   : > { %v1177_v36 = vsel %vm702_vm5, 0.0, %v3821_v33  ;;  %v1176_v37 = vsel %vm702_vm5, 0.0, %v3820_v34  ;;  %3467 = vmatpush3.bf16.msk.msra.mxu1 %vm4412_vm7, %v3462_v31  ;;  %3823 = vrot.lane.b32.xlu1 %v3822_v35, %s4166_s18 }
 0x9fc   : > { %v1181_v38 = vsel %vm707_vm6, %v1177_v36, 0.0  ;;  %v1180_v39 = vsel %vm707_vm6, %v1176_v37, 0.0  ;;  %v3468_v40 = vpack.c.bf16 %v1177_v36, %v1176_v37 }
 0x9fd   : > { %v3827_v41 = vpack.i.bf16 %v1181_v38, %v1180_v39 }
 0x9fe   : > { %3470 = vmatprep.subr.msk.bf16.mxu1 %vm4412_vm7, %v3468_v40 }
 0x9ff   : > { %3828 = vrot.lane.b32.xlu0 %v3827_v41, %s4166_s18  ;;  %3473 = vmatpush3.bf16.msk.msra.mxu1 %vm4412_vm7, %v3468_v40 }
 0xa00   : > { %3833 = vrot.lane.b32.xlu1 %v3822_v35, %s4167_s15 }
 0xa03   : > { %3838 = vrot.lane.b32.xlu0 %v3827_v41, %s4167_s15 }
 0xa04   : > { %1222 = vperm.xlu1 %3735, %v1216_v43  }
 0xa07   : > { %1227 = vperm.xlu0 %3736, %v1217_v44  }
 0xa08   : > { %1232 = vperm.xlu1 %3735, %v1218_v45  }
 0xa0b   : > { %1237 = vperm.xlu0 %3736, %v1219_v46  }
 0xa6d   : > { %v3824_v47 = vpop.permute.xlu1 %3823 }
 0xa6e   : > { %v3826_v48 = vunpack.i.h.bf16 %v3824_v47  ;;  %v3825_v49 = vunpack.i.l.bf16 %v3824_v47  ;;  %v1394_v47 = vld [vmem:[#allocation4 + $0xc0] sm:$0xff] }
 0xa6f   : > { %3200 = vmatprep.mubr.msk.f32.mxu0 %vm770_vm8, %v1394_v47 }
 0xa70   : > { %v3474_v50 = vpack.c.bf16 %v3826_v48, %v3825_v49  ;;  %v1397_v48 = vld [vmem:[#allocation6 + $0xc0] sm:$0xff]  ;;  %v1398_v49 = vld [vmem:[#allocation6 + $0xc8] sm:$0xff] }
 0xa71   : > { %v3829_v51 = vpop.permute.xlu0 %3828 }
 0xa72   : > { %v3831_v52 = vunpack.i.h.bf16 %v3829_v51  ;;  %v3830_v53 = vunpack.i.l.bf16 %v3829_v51  ;;  %v3834_v54 = vpop.permute.xlu1 %3833  ;;  %3475 = vmatprep.subr.bf16.mxu1 %v3474_v50  ;;  %v1499_v51 = vld [vmem:[#allocation6 + $0xe8] sm:$0xff] }
 0xa73   : > { %v3836_v55 = vunpack.i.h.bf16 %v3834_v54  ;;  %v3835_v56 = vunpack.i.l.bf16 %v3834_v54  ;;  %3477 = vmatpush3.bf16.msra.mxu1 %v3474_v50  ;;  %v1498_v50 = vld [vmem:[#allocation6 + $0xe0] sm:$0xff] }
 0xa74   : > { %v3478_v57 = vpack.c.bf16 %v3831_v52, %v3830_v53  ;;  %v1500_v52 = vld [vmem:[#allocation6 + $0xf0] sm:$0xff]  ;;  %v1501_v53 = vld [vmem:[#allocation6 + $0xf8] sm:$0xff] }
 0xa75   : > { %v3839_v59 = vpop.permute.xlu0 %3838  ;;  %v3482_v61 = vpack.c.bf16 %v3836_v55, %v3835_v56 }
 0xa76   : > { %v3841_v62 = vunpack.i.h.bf16 %v3839_v59  ;;  %v3840_v63 = vunpack.i.l.bf16 %v3839_v59  ;;  %3479 = vmatprep.subr.bf16.mxu1 %v3478_v57 }
 0xa77   : > { %3481 = vmatpush3.bf16.msra.mxu1 %v3478_v57 }
 0xa78   : > { %3483 = vmatprep.subr.bf16.mxu1 %v3482_v61  ;;  %v3486_v0 = vpack.c.bf16 %v3841_v62, %v3840_v63 }
 0xa7b   : > { %3485 = vmatpush3.bf16.msra.mxu1 %v3482_v61 }
 0xa7c   : > { %3487 = vmatprep.subr.bf16.mxu1 %v3486_v0 }
 0xa7f   : > { %3489 = vmatpush3.bf16.msra.mxu1 %v3486_v0 }
 0xa82   : > { %3171 = vmatmul.mubr.msk.f32.vlgmr.msra.gmra.mrb[12].mxu1 %vm770_vm8, %v1212_v1 }
 0xa83   : > { %3173 = vmatprep.mubr.msk.f32.mxu1 %vm770_vm8, %v1213_v3  ;;  %v1223_v7 = vpop.permute.xlu1 %1222 }
 0xa86   : > { %3174 = vmatmul.mubr.msk.f32.gmra.mrb[14].mxu1 %vm770_vm8, %v1214_v5  ;;  %v1228_v6 = vpop.permute.xlu0 %1227 }
 0xa87   : > { %v1233_v21 = vpop.permute.xlu1 %1232 }
 0xa8a   : > { %v1238_v15 = vpop.permute.xlu0 %1237 }
 0xb55   : > { %v3172_v8 = vpop.f32.mrb[12].mxu1 }
 0xb56   : > { %v4528_v9 = vadd.f32 %v3172_v8, %v1228_v6  ;;  %v1318_v10 = vpop.f32.mrb[13].mxu1 }
 0xb57   : > { %v4530_v12 = vadd.f32 %v1318_v10, %v1223_v7  ;;  %v1395_v10 = vld [vmem:[#allocation4 + $0xc8] sm:$0xff] }
 0xb58   : > { %v1338_v14 = vmax.f32 %v4528_v9, 0.0 }
 0xb59   : > { %v1337_v18 = vmax.f32 %v4530_v12, 0.0  ;;  %v3175_v19 = vpop.f32.mrb[14].mxu1 }
 0xb5a   : > { %v4534_v58 = vadd.f32 %v3175_v19, %v1238_v15  ;;  %v1328_v2 = vpop.f32.mrb[15].mxu1 }
 0xb5b   : > { %v4536_v4 = vadd.f32 %v1328_v2, %v1233_v21  ;;  %v3842_v25 = vpack.i.bf16 %v1338_v14, %v1337_v18  ;;  %v1493_v14 = vld [vmem:[#allocation4 + $0xe0] sm:$0xff] }
 0xb5c   : > { %v1340_v26 = vmax.f32 %v4534_v58, 0.0  ;;  %3207 = vmatprep.mubr.msk.f32.mxu1 %vm366_vm2, %v1493_v14 }
 0xb5d   : > { %v1339_v27 = vmax.f32 %v4536_v4, 0.0  ;;  %3843 = vrot.lane.b32.xlu1 %v3842_v25, %s4165_s13 }
 0xb5f   : > { %v3847_v28 = vpack.i.bf16 %v1340_v26, %v1339_v27 }
 0xb61   : > { %3848 = vrot.lane.b32.xlu0 %v3847_v28, %s4165_s13 }
 0xbcf   : > { %v3844_v29 = vpop.permute.xlu1 %3843 }
 0xbd0   : > { %v3846_v30 = vunpack.i.h.bf16 %v3844_v29  ;;  %v3845_v31 = vunpack.i.l.bf16 %v3844_v29  ;;  %v1494_v29 = vld [vmem:[#allocation4 + $0xe8] sm:$0xff] }
 0xbd2   : > { %v1358_v32 = vsel %vm702_vm5, 0.0, %v3846_v30  ;;  %v1357_v33 = vsel %vm702_vm5, 0.0, %v3845_v31  ;;  %v1495_v30 = vld [vmem:[#allocation4 + $0xf0] sm:$0xff]  ;;  %v1496_v31 = vld [vmem:[#allocation4 + $0xf8] sm:$0xff] }
 0xbd3   : > { %v1362_v34 = vsel %vm707_vm6, %v1358_v32, 0.0  ;;  %v1361_v35 = vsel %vm707_vm6, %v1357_v33, 0.0  ;;  %v3490_v36 = vpack.c.bf16 %v1358_v32, %v1357_v33  ;;  %v3849_v37 = vpop.permute.xlu0 %3848  ;;  %v1628_v32 = vld [vmem:[#allocation7 + $0x40] sm:$0xff] }
 0xbd4   : > { %v3851_v38 = vunpack.i.h.bf16 %v3849_v37  ;;  %v3850_v39 = vunpack.i.l.bf16 %v3849_v37  ;;  %v3852_v40 = vpack.i.bf16 %v1362_v34, %v1361_v35 }
 0xbd5   : > { %3492 = vmatprep.subr.msk.bf16.mxu0 %vm4412_vm7, %v3490_v36 }
 0xbd6   : > { %v1360_v41 = vsel %vm702_vm5, 0.0, %v3851_v38  ;;  %v1359_v42 = vsel %vm702_vm5, 0.0, %v3850_v39  ;;  %3495 = vmatpush3.bf16.msk.msra.mxu0 %vm4412_vm7, %v3490_v36  ;;  %3853 = vrot.lane.b32.xlu1 %v3852_v40, %s4166_s18 }
 0xbd7   : > { %v1364_v43 = vsel %vm707_vm6, %v1360_v41, 0.0  ;;  %v1363_v44 = vsel %vm707_vm6, %v1359_v42, 0.0  ;;  %v3496_v45 = vpack.c.bf16 %v1360_v41, %v1359_v42 }
 0xbd8   : > { %v3857_v46 = vpack.i.bf16 %v1364_v43, %v1363_v44 }
 0xbd9   : > { %3498 = vmatprep.subr.msk.bf16.mxu0 %vm4412_vm7, %v3496_v45 }
 0xbda   : > { %3858 = vrot.lane.b32.xlu0 %v3857_v46, %s4166_s18  ;;  %3501 = vmatpush3.bf16.msk.msra.mxu0 %vm4412_vm7, %v3496_v45 }
 0xbdb   : > { %3863 = vrot.lane.b32.xlu1 %v3852_v40, %s4167_s15 }
 0xbde   : > { %3868 = vrot.lane.b32.xlu0 %v3857_v46, %s4167_s15 }
 0xbdf   : > { %1401 = vperm.xlu1 %3735, %v1397_v48  }
 0xbe2   : > { %1406 = vperm.xlu0 %3736, %v1398_v49  }
 0xbe3   : > { %1504 = vperm.xlu1 %3735, %v1498_v50  }
 0xbe6   : > { %1509 = vperm.xlu0 %3736, %v1499_v51  }
 0xbe7   : > { %1514 = vperm.xlu1 %3735, %v1500_v52  }
 0xbea   : > { %1519 = vperm.xlu0 %3736, %v1501_v53  }
 0xc48   : > { %v3854_v17 = vpop.permute.xlu1 %3853 }
 0xc49   : > { %v3856_v54 = vunpack.i.h.bf16 %v3854_v17  ;;  %v3855_v55 = vunpack.i.l.bf16 %v3854_v17 }
 0xc4b   : > { %v3502_v56 = vpack.c.bf16 %v3856_v54, %v3855_v55 }
 0xc4c   : > { %v3859_v57 = vpop.permute.xlu0 %3858 }
 0xc4d   : > { %v3861_v59 = vunpack.i.h.bf16 %v3859_v57  ;;  %v3860_v61 = vunpack.i.l.bf16 %v3859_v57  ;;  %v3864_v62 = vpop.permute.xlu1 %3863  ;;  %3503 = vmatprep.subr.bf16.mxu0 %v3502_v56  ;;  %v1768_v57 = vld [vmem:[#allocation4 + $0x100] sm:$0xff] }
 0xc4e   : > { %v3866_v63 = vunpack.i.h.bf16 %v3864_v62  ;;  %v3865_v0 = vunpack.i.l.bf16 %v3864_v62  ;;  %3505 = vmatpush3.bf16.msra.mxu0 %v3502_v56  ;;  %v1773_v56 = vld [vmem:[#allocation6 + $0x100] sm:$0xff]  ;;  %v1776_v62 = vld [vmem:[#allocation6 + $0x118] sm:$0xff] }
 0xc4f   : > { %v3506_v1 = vpack.c.bf16 %v3861_v59, %v3860_v61  ;;  %v1775_v59 = vld [vmem:[#allocation6 + $0x110] sm:$0xff]  ;;  %v1774_v61 = vld [vmem:[#allocation6 + $0x108] sm:$0xff] }
 0xc50   : > { %v3869_v3 = vpop.permute.xlu0 %3868  ;;  %v3510_v5 = vpack.c.bf16 %v3866_v63, %v3865_v0 }
 0xc51   : > { %v3871_v6 = vunpack.i.h.bf16 %v3869_v3  ;;  %v3870_v7 = vunpack.i.l.bf16 %v3869_v3  ;;  %3507 = vmatprep.subr.bf16.mxu0 %v3506_v1 }
 0xc52   : > { %3509 = vmatpush3.bf16.msra.mxu0 %v3506_v1 }
 0xc53   : > { %3511 = vmatprep.subr.bf16.mxu0 %v3510_v5  ;;  %v3514_v8 = vpack.c.bf16 %v3871_v6, %v3870_v7 }
 0xc56   : > { %3513 = vmatpush3.bf16.msra.mxu0 %v3510_v5 }
 0xc57   : > { %3515 = vmatprep.subr.bf16.mxu0 %v3514_v8 }
 0xc5a   : > { %3517 = vmatpush3.bf16.msra.mxu0 %v3514_v8 }
 0xc5b   : > { %3213 = vmatprep.subr.mxu0 %v1628_v32 }
 0xc5d   : > { %3201 = vmatmul.mubr.msk.f32.vlgmr.msra.gmra.mrb[8].mxu0 %vm770_vm8, %v1395_v10 }
 0xc5e   : > { %v1402_v19 = vpop.permute.xlu1 %1401  ;;  %3214 = vmatpush3.msra.mxu0 %v1628_v32 }
 0xc61   : > { %v1407_v15 = vpop.permute.xlu0 %1406 }
 0xc62   : > { %v1505_v34 = vpop.permute.xlu1 %1504 }
 0xc65   : > { %v1510_v33 = vpop.permute.xlu0 %1509 }
 0xc66   : > { %v1515_v43 = vpop.permute.xlu1 %1514 }
 0xc69   : > { %v1520_v40 = vpop.permute.xlu0 %1519 }
 0xd30   : > { %v3202_v18 = vpop.f32.mrb[8].mxu0 }
 0xd31   : > { %v1487_v21 = vadd.f32 %v3202_v18, %v1407_v15  ;;  %v1481_v2 = vpop.f32.mrb[9].mxu0 }
 0xd32   : > { %v1482_v25 = vadd.f32 %v1481_v2, %v1402_v19 }
 0xd33   : > { %v1491_v26 = vmax.f32 %v1487_v21, 0.0 }
 0xd34   : > { %v1490_v27 = vmax.f32 %v1482_v25, 0.0 }
 0xd36   : > { %v3518_v28 = vpack.c.bf16 %v1491_v26, %v1490_v27 }
 0xd38   : > { %3519 = vmatprep.subr.bf16.mxu1 %v3518_v28 }
 0xd39   : > { %3521 = vmatpush3.bf16.msra.mxu1 %v3518_v28 }
 0xd3c   : > { %3208 = vmatmul.mubr.msk.f32.vlgmr.msra.gmra.mrb[16].mxu1 %vm366_vm2, %v1494_v29 }
 0xd3d   : > { %3210 = vmatprep.mubr.msk.f32.mxu1 %vm366_vm2, %v1495_v30 }
 0xd40   : > { %3211 = vmatmul.mubr.msk.f32.gmra.mrb[18].mxu1 %vm366_vm2, %v1496_v31 }
 0xd41   : > { %3253 = vmatprep.mubr.f32.mxu1 %v1768_v57 }
 0xe0f   : > { %v3209_v35 = vpop.f32.mrb[16].mxu1 }
 0xe10   : > { %v1606_v36 = vadd.f32 %v3209_v35, %v1510_v33  ;;  %v1600_v37 = vpop.f32.mrb[17].mxu1  ;;  %v1770_v35 = vld [vmem:[#allocation4 + $0x110] sm:$0xff] }
 0xe11   : > { %v1601_v38 = vadd.f32 %v1600_v37, %v1505_v34  ;;  %v1769_v34 = vld [vmem:[#allocation4 + $0x108] sm:$0xff]  ;;  %v1887_v37 = vld [vmem:[#allocation7 + $0x60] sm:$0xff] }
 0xe12   : > { %v4569_v39 = vadd.f32 %v1606_v36, %v4528_v9  ;;  %v1771_v36 = vld [vmem:[#allocation4 + $0x118] sm:$0xff]  ;;  %3259 = vmatprep.subr.msk.mxu0 %vm349_vm3, %v1887_v37 }
 0xe13   : > { %v4572_v41 = vadd.f32 %v1601_v38, %v4530_v12  ;;  %v3212_v42 = vpop.f32.mrb[18].mxu1 }
 0xe14   : > { %v1616_v44 = vadd.f32 %v3212_v42, %v1520_v40  ;;  %v1610_v45 = vpop.f32.mrb[19].mxu1  ;;  %v1624_v48 = vmax.f32 %v4569_v39, 0.0 }
 0xe15   : > { %v1623_v46 = vmax.f32 %v4572_v41, 0.0  ;;  %v1611_v47 = vadd.f32 %v1610_v45, %v1515_v43 }
 0xe16   : > { %v4577_v49 = vadd.f32 %v1616_v44, %v4534_v58 }
 0xe17   : > { %v4580_v9 = vadd.f32 %v1611_v47, %v4536_v4  ;;  %3215 = vmatprep.mubr.msk.f32.mxu0 %vm1629_vm9, %v1623_v46 }
 0xe18   : > { %3216 = vmatmul.mubr.msk.f32.vlgmr.msra.gmra.mrb[10].mxu0 %vm1629_vm9, %v1624_v48  ;;  %v1626_v50 = vmax.f32 %v4577_v49, 0.0 }
 0xe19   : > { %v1625_v12 = vmax.f32 %v4580_v9, 0.0  ;;  %3260 = vmatpush3.msk.msra.mxu0 %vm349_vm3, %v1887_v37 }
 0xe1b   : > { %3218 = vmatprep.mubr.msk.f32.mxu0 %vm1629_vm9, %v1625_v12 }
 0xe1c   : > { %3219 = vmatmul.mubr.msk.f32.gmra.mrb[12].mxu0 %vm1629_vm9, %v1626_v50 }
 0xeeb   : > { %v3217_v58 = vpop.f32.mrb[10].mxu0 }
 0xeec   : > { %v1708_v4 = vpop.f32.mrb[11].mxu0 }
 0xeed   : > { %v3872_v51 = vpack.i.bf16 %v3217_v58, %v1708_v4  ;;  %v3522_v52 = vpack.c.bf16 %v3217_v58, %v1708_v4 }
 0xeef   : > { %3873 = vrot.lane.b32.xlu1 %v3872_v51, %s4168_s22  ;;  %v3220_v53 = vpop.f32.mrb[12].mxu0  ;;  %3523 = vmatprep.subr.bf16.mxu1 %v3522_v52 }
 0xef0   : > { %v1718_v17 = vpop.f32.mrb[13].mxu0  ;;  %3525 = vmatpush3.bf16.msra.mxu1 %v3522_v52 }
 0xef1   : > { %v3877_v54 = vpack.i.bf16 %v3220_v53, %v1718_v17  ;;  %v3526_v55 = vpack.c.bf16 %v3220_v53, %v1718_v17 }
 0xef3   : > { %3883 = vrot.lane.b32.xlu1 %v3872_v51, %s4164_s12  ;;  %3878 = vrot.lane.b32.xlu0 %v3877_v54, %s4168_s22 }
 0xef4   : > { %3527 = vmatprep.subr.bf16.mxu1 %v3526_v55 }
 0xef5   : > { %3529 = vmatpush3.bf16.msra.mxu1 %v3526_v55 }
 0xef7   : > { %3893 = vrot.lane.b32.xlu1 %v3872_v51, %s4169_s25  ;;  %3888 = vrot.lane.b32.xlu0 %v3877_v54, %s4164_s12 }
 0xefb   : > { %1779 = vperm.xlu1 %3735, %v1773_v56   ;;  %3898 = vrot.lane.b32.xlu0 %v3877_v54, %s4169_s25 }
 0xeff   : > { %1789 = vperm.xlu1 %3735, %v1775_v59   ;;  %1784 = vperm.xlu0 %3736, %v1774_v61  }
 0xf03   : > { %1794 = vperm.xlu0 %3736, %v1776_v62  }
 0xf61   : > { %v3874_v63 = vpop.permute.xlu1 %3873 }
 0xf62   : > { %v3876_v0 = vunpack.i.h.bf16 %v3874_v63  ;;  %v3875_v1 = vunpack.i.l.bf16 %v3874_v63 }
 0xf64   : > { %v3530_v3 = vpack.c.bf16 %v3876_v0, %v3875_v1 }
 0xf65   : > { %v3884_v5 = vpop.permute.xlu1 %3883  ;;  %v3879_v6 = vpop.permute.xlu0 %3878 }
 0xf66   : > { %v3886_v7 = vunpack.i.h.bf16 %v3884_v5  ;;  %v3885_v8 = vunpack.i.l.bf16 %v3884_v5  ;;  %v3881_v10 = vunpack.i.h.bf16 %v3879_v6  ;;  %v3880_v14 = vunpack.i.l.bf16 %v3879_v6  ;;  %3531 = vmatprep.subr.bf16.mxu1 %v3530_v3  ;;  %v2035_v5 = vld [vmem:[#allocation6 + $0x120] sm:$0xff] }
 0xf67   : > { %3533 = vmatpush3.bf16.msra.mxu1 %v3530_v3  ;;  %v2030_v6 = vld [vmem:[#allocation4 + $0x120] sm:$0xff] }
 0xf68   : > { %v3534_v15 = vpack.c.bf16 %v3881_v10, %v3880_v14  ;;  %v3538_v19 = vpack.c.bf16 %v3886_v7, %v3885_v8  ;;  %v2037_v7 = vld [vmem:[#allocation6 + $0x130] sm:$0xff]  ;;  %v2036_v8 = vld [vmem:[#allocation6 + $0x128] sm:$0xff]  ;;  %v2038_v10 = vld [vmem:[#allocation6 + $0x138] sm:$0xff] }
 0xf69   : > { %v3889_v18 = vpop.permute.xlu0 %3888  ;;  %v3894_v25 = vpop.permute.xlu1 %3893 }
 0xf6a   : > { %v3891_v21 = vunpack.i.h.bf16 %v3889_v18  ;;  %v3890_v2 = vunpack.i.l.bf16 %v3889_v18  ;;  %3535 = vmatprep.subr.bf16.mxu1 %v3534_v15  ;;  %v3896_v26 = vunpack.i.h.bf16 %v3894_v25  ;;  %v3895_v27 = vunpack.i.l.bf16 %v3894_v25 }
 0xf6b   : > { %3537 = vmatpush3.bf16.msra.mxu1 %v3534_v15 }
 0xf6c   : > { %3539 = vmatprep.subr.bf16.mxu1 %v3538_v19  ;;  %v3542_v28 = vpack.c.bf16 %v3891_v21, %v3890_v2  ;;  %v3546_v30 = vpack.c.bf16 %v3896_v26, %v3895_v27 }
 0xf6d   : > { %v3899_v29 = vpop.permute.xlu0 %3898 }
 0xf6e   : > { %v3901_v31 = vunpack.i.h.bf16 %v3899_v29  ;;  %v3900_v32 = vunpack.i.l.bf16 %v3899_v29 }
 0xf6f   : > { %3541 = vmatpush3.bf16.msra.mxu1 %v3538_v19 }
 0xf70   : > { %3543 = vmatprep.subr.bf16.mxu1 %v3542_v28  ;;  %v3550_v33 = vpack.c.bf16 %v3901_v31, %v3900_v32 }
 0xf73   : > { %3545 = vmatpush3.bf16.msra.mxu1 %v3542_v28 }
 0xf74   : > { %3547 = vmatprep.subr.bf16.mxu1 %v3546_v30 }
 0xf77   : > { %3549 = vmatpush3.bf16.msra.mxu1 %v3546_v30 }
 0xf78   : > { %3551 = vmatprep.subr.bf16.mxu1 %v3550_v33 }
 0xf7a   : > { %v1780_v40 = vpop.permute.xlu1 %1779 }
 0xf7b   : > { %3553 = vmatpush3.bf16.msra.mxu1 %v3550_v33 }
 0xf7e   : > { %3254 = vmatmul.mubr.f32.vlgmr.msra.gmra.mrb[20].mxu1 %v1769_v34  ;;  %v1785_v38 = vpop.permute.xlu0 %1784  ;;  %v1790_v51 = vpop.permute.xlu1 %1789 }
 0xf7f   : > { %3256 = vmatprep.mubr.f32.mxu1 %v1770_v35 }
 0xf82   : > { %3257 = vmatmul.mubr.f32.gmra.mrb[22].mxu1 %v1771_v36  ;;  %v1795_v47 = vpop.permute.xlu0 %1794 }
0x1051   : > { %v3255_v42 = vpop.f32.mrb[20].mxu1 }
0x1052   : > { %v1869_v43 = vadd.f32 %v3255_v42, %v1785_v38  ;;  %v1863_v44 = vpop.f32.mrb[21].mxu1 }
0x1053   : > { %v1864_v45 = vadd.f32 %v1863_v44, %v1780_v40 }
0x1054   : > { %v1883_v52 = vmax.f32 %v1869_v43, 0.0 }
0x1055   : > { %v1882_v58 = vmax.f32 %v1864_v45, 0.0  ;;  %v3258_v4 = vpop.f32.mrb[22].mxu1  ;;  %v2031_v45 = vld [vmem:[#allocation4 + $0x128] sm:$0xff] }
0x1056   : > { %v1879_v53 = vadd.f32 %v3258_v4, %v1795_v47  ;;  %v1873_v17 = vpop.f32.mrb[23].mxu1  ;;  %v2032_v47 = vld [vmem:[#allocation4 + $0x130] sm:$0xff] }
0x1057   : > { %v1874_v54 = vadd.f32 %v1873_v17, %v1790_v51  ;;  %3261 = vmatprep.mubr.msk.f32.mxu0 %vm1888_vm10, %v1882_v58  ;;  %v2033_v58 = vld [vmem:[#allocation4 + $0x138] sm:$0xff] }
0x1058   : > { %3262 = vmatmul.mubr.msk.f32.vlgmr.msra.gmra.mrb[14].mxu0 %vm1888_vm10, %v1883_v52  ;;  %v1885_v56 = vmax.f32 %v1879_v53, 0.0 }
0x1059   : > { %v1884_v55 = vmax.f32 %v1874_v54, 0.0 }
0x105b   : > { %3264 = vmatprep.mubr.msk.f32.mxu0 %vm1888_vm10, %v1884_v55 }
0x105c   : > { %3265 = vmatmul.mubr.msk.f32.gmra.mrb[16].mxu0 %vm1888_vm10, %v1885_v56 }
0x105d   : > { %3299 = vmatprep.mubr.f32.mxu0 %v2030_v6 }
0x112b   : > { %v3263_v57 = vpop.f32.mrb[14].mxu0 }
0x112c   : > { %v1970_v59 = vpop.f32.mrb[15].mxu0 }
0x112d   : > { %v3902_v61 = vpack.i.bf16 %v3263_v57, %v1970_v59  ;;  %v3554_v62 = vpack.c.bf16 %v3263_v57, %v1970_v59 }
0x112f   : > { %3903 = vrot.lane.b32.xlu1 %v3902_v61, %s4167_s15  ;;  %v3266_v63 = vpop.f32.mrb[16].mxu0  ;;  %3555 = vmatprep.subr.bf16.mxu0 %v3554_v62 }
0x1130   : > { %v1980_v0 = vpop.f32.mrb[17].mxu0  ;;  %3557 = vmatpush3.bf16.msra.mxu0 %v3554_v62 }
0x1131   : > { %v3907_v1 = vpack.i.bf16 %v3266_v63, %v1980_v0  ;;  %v3558_v3 = vpack.c.bf16 %v3266_v63, %v1980_v0 }
0x1133   : > { %3913 = vrot.lane.b32.xlu1 %v3902_v61, %s4168_s22  ;;  %3908 = vrot.lane.b32.xlu0 %v3907_v1, %s4167_s15 }
0x1134   : > { %3559 = vmatprep.subr.bf16.mxu0 %v3558_v3 }
0x1135   : > { %3561 = vmatpush3.bf16.msra.mxu0 %v3558_v3 }
0x1137   : > { %3923 = vrot.lane.b32.xlu1 %v3902_v61, %s4170_s27  ;;  %3918 = vrot.lane.b32.xlu0 %v3907_v1, %s4168_s22 }
0x113b   : > { %2041 = vperm.xlu1 %3735, %v2035_v5   ;;  %3928 = vrot.lane.b32.xlu0 %v3907_v1, %s4170_s27 }
0x113f   : > { %2051 = vperm.xlu1 %3735, %v2037_v7   ;;  %2046 = vperm.xlu0 %3736, %v2036_v8  }
0x1143   : > { %2056 = vperm.xlu0 %3736, %v2038_v10  }
0x11a1   : > { %v3904_v14 = vpop.permute.xlu1 %3903 }
0x11a2   : > { %v3906_v15 = vunpack.i.h.bf16 %v3904_v14  ;;  %v3905_v18 = vunpack.i.l.bf16 %v3904_v14 }
0x11a4   : > { %v3562_v19 = vpack.c.bf16 %v3906_v15, %v3905_v18 }
0x11a5   : > { %v3914_v21 = vpop.permute.xlu1 %3913  ;;  %v3909_v2 = vpop.permute.xlu0 %3908 }
0x11a6   : > { %v3916_v25 = vunpack.i.h.bf16 %v3914_v21  ;;  %v3915_v26 = vunpack.i.l.bf16 %v3914_v21  ;;  %v3911_v27 = vunpack.i.h.bf16 %v3909_v2  ;;  %v3910_v28 = vunpack.i.l.bf16 %v3909_v2  ;;  %3563 = vmatprep.subr.bf16.mxu0 %v3562_v19 }
0x11a7   : > { %3565 = vmatpush3.bf16.msra.mxu0 %v3562_v19 }
0x11a8   : > { %v3566_v29 = vpack.c.bf16 %v3911_v27, %v3910_v28  ;;  %v3570_v31 = vpack.c.bf16 %v3916_v25, %v3915_v26 }
0x11a9   : > { %v3919_v30 = vpop.permute.xlu0 %3918  ;;  %v3924_v34 = vpop.permute.xlu1 %3923 }
0x11aa   : > { %v3921_v32 = vunpack.i.h.bf16 %v3919_v30  ;;  %v3920_v33 = vunpack.i.l.bf16 %v3919_v30  ;;  %3567 = vmatprep.subr.bf16.mxu0 %v3566_v29  ;;  %v3926_v35 = vunpack.i.h.bf16 %v3924_v34  ;;  %v3925_v36 = vunpack.i.l.bf16 %v3924_v34 }
0x11ab   : > { %3569 = vmatpush3.bf16.msra.mxu0 %v3566_v29 }
0x11ac   : > { %3571 = vmatprep.subr.bf16.mxu0 %v3570_v31  ;;  %v3574_v37 = vpack.c.bf16 %v3921_v32, %v3920_v33  ;;  %v3578_v40 = vpack.c.bf16 %v3926_v35, %v3925_v36  ;;  %v2202_v35 = vld [vmem:[#allocation4 + $0x140] sm:$0xff] }
0x11ad   : > { %v3929_v38 = vpop.permute.xlu0 %3928  ;;  %3329 = vmatprep.mubr.msk.f32.mxu1 %vm770_vm8, %v2202_v35  ;;  %v2207_v36 = vld [vmem:[#allocation6 + $0x140] sm:$0xff] }
0x11ae   : > { %v3931_v42 = vunpack.i.h.bf16 %v3929_v38  ;;  %v3930_v43 = vunpack.i.l.bf16 %v3929_v38  ;;  %v2209_v38 = vld [vmem:[#allocation6 + $0x150] sm:$0xff] }
0x11af   : > { %3573 = vmatpush3.bf16.msra.mxu0 %v3570_v31 }
0x11b0   : > { %3575 = vmatprep.subr.bf16.mxu0 %v3574_v37  ;;  %v3582_v44 = vpack.c.bf16 %v3931_v42, %v3930_v43 }
0x11b3   : > { %3577 = vmatpush3.bf16.msra.mxu0 %v3574_v37  ;;  %v2208_v37 = vld [vmem:[#allocation6 + $0x148] sm:$0xff] }
0x11b4   : > { %3579 = vmatprep.subr.bf16.mxu0 %v3578_v40 }
0x11b7   : > { %3581 = vmatpush3.bf16.msra.mxu0 %v3578_v40  ;;  %v2210_v40 = vld [vmem:[#allocation6 + $0x158] sm:$0xff] }
0x11b8   : > { %3583 = vmatprep.subr.bf16.mxu0 %v3582_v44 }
0x11ba   : > { %v2042_v51 = vpop.permute.xlu1 %2041 }
0x11bb   : > { %3585 = vmatpush3.bf16.msra.mxu0 %v3582_v44 }
0x11be   : > { %3300 = vmatmul.mubr.f32.vlgmr.msra.gmra.mrb[18].mxu0 %v2031_v45  ;;  %v2047_v4 = vpop.permute.xlu0 %2046  ;;  %v2052_v61 = vpop.permute.xlu1 %2051 }
0x11bf   : > { %3302 = vmatprep.mubr.f32.mxu0 %v2032_v47 }
0x11c2   : > { %3303 = vmatmul.mubr.f32.gmra.mrb[20].mxu0 %v2033_v58  ;;  %v2057_v56 = vpop.permute.xlu0 %2056 }
0x1291   : > { %v3301_v52 = vpop.f32.mrb[18].mxu0 }
0x1292   : > { %v2131_v53 = vadd.f32 %v3301_v52, %v2047_v4  ;;  %v2125_v17 = vpop.f32.mrb[19].mxu0 }
0x1293   : > { %v2126_v54 = vadd.f32 %v2125_v17, %v2042_v51 }
0x1294   : > { %v2145_v55 = vmax.f32 %v2131_v53, 0.0 }
0x1295   : > { %v2144_v57 = vmax.f32 %v2126_v54, 0.0  ;;  %v3304_v59 = vpop.f32.mrb[20].mxu0 }
0x1296   : > { %v2141_v62 = vadd.f32 %v3304_v59, %v2057_v56  ;;  %v2135_v63 = vpop.f32.mrb[21].mxu0 }
0x1297   : > { %v3932_v0 = vpack.i.bf16 %v2145_v55, %v2144_v57  ;;  %v2136_v1 = vadd.f32 %v2135_v63, %v2052_v61  ;;  %v2203_v61 = vld [vmem:[#allocation4 + $0x148] sm:$0xff]  ;;  %v2205_v63 = vld [vmem:[#allocation4 + $0x158] sm:$0xff] }
0x1298   : > { %v2147_v3 = vmax.f32 %v2141_v62, 0.0  ;;  %v2204_v62 = vld [vmem:[#allocation4 + $0x150] sm:$0xff] }
0x1299   : > { %v2146_v5 = vmax.f32 %v2136_v1, 0.0  ;;  %3933 = vrot.lane.b32.xlu1 %v3932_v0, %s4165_s13 }
0x129b   : > { %v3937_v6 = vpack.i.bf16 %v2147_v3, %v2146_v5 }
0x129d   : > { %3938 = vrot.lane.b32.xlu0 %v3937_v6, %s4165_s13 }
0x130b   : > { %v3934_v7 = vpop.permute.xlu1 %3933 }
0x130c   : > { %v3936_v8 = vunpack.i.h.bf16 %v3934_v7  ;;  %v3935_v10 = vunpack.i.l.bf16 %v3934_v7 }
0x130e   : > { %v2165_v14 = vsel %vm702_vm5, 0.0, %v3936_v8  ;;  %v2164_v15 = vsel %vm702_vm5, 0.0, %v3935_v10 }
0x130f   : > { %v2170_v19 = vsel %vm2168_vm11, %v2165_v14, 0.0  ;;  %v2169_v21 = vsel %vm2168_vm11, %v2164_v15, 0.0  ;;  %v3586_v2 = vpack.c.bf16 %v2165_v14, %v2164_v15  ;;  %v3939_v25 = vpop.permute.xlu0 %3938 }
0x1310   : > { %v3941_v26 = vunpack.i.h.bf16 %v3939_v25  ;;  %v3940_v27 = vunpack.i.l.bf16 %v3939_v25  ;;  %v3942_v28 = vpack.i.bf16 %v2170_v19, %v2169_v21 }
0x1311   : > { %3588 = vmatprep.subr.msk.bf16.mxu1 %vm4612_vm12, %v3586_v2 }
0x1312   : > { %v2167_v29 = vsel %vm702_vm5, 0.0, %v3941_v26  ;;  %v2166_v30 = vsel %vm702_vm5, 0.0, %v3940_v27  ;;  %3591 = vmatpush3.bf16.msk.msra.mxu1 %vm4612_vm12, %v3586_v2  ;;  %3943 = vrot.lane.b32.xlu1 %v3942_v28, %s4166_s18 }
0x1313   : > { %v2172_v31 = vsel %vm2168_vm11, %v2167_v29, 0.0  ;;  %v2171_v32 = vsel %vm2168_vm11, %v2166_v30, 0.0  ;;  %v3592_v33 = vpack.c.bf16 %v2167_v29, %v2166_v30 }
0x1314   : > { %v3947_v34 = vpack.i.bf16 %v2172_v31, %v2171_v32 }
0x1315   : > { %3594 = vmatprep.subr.msk.bf16.mxu1 %vm4612_vm12, %v3592_v33 }
0x1316   : > { %3948 = vrot.lane.b32.xlu0 %v3947_v34, %s4166_s18  ;;  %3597 = vmatpush3.bf16.msk.msra.mxu1 %vm4612_vm12, %v3592_v33 }
0x1317   : > { %3953 = vrot.lane.b32.xlu1 %v3942_v28, %s4167_s15 }
0x131a   : > { %3958 = vrot.lane.b32.xlu0 %v3947_v34, %s4167_s15 }
0x131b   : > { %2213 = vperm.xlu1 %3735, %v2207_v36  }
0x131e   : > { %2218 = vperm.xlu0 %3736, %v2208_v37  }
0x131f   : > { %2223 = vperm.xlu1 %3735, %v2209_v38  }
0x1322   : > { %2228 = vperm.xlu0 %3736, %v2210_v40  }
0x1384   : > { %v3944_v42 = vpop.permute.xlu1 %3943 }
0x1385   : > { %v3946_v43 = vunpack.i.h.bf16 %v3944_v42  ;;  %v3945_v44 = vunpack.i.l.bf16 %v3944_v42 }
0x1387   : > { %v3598_v45 = vpack.c.bf16 %v3946_v43, %v3945_v44 }
0x1388   : > { %v3949_v47 = vpop.permute.xlu0 %3948 }
0x1389   : > { %v3951_v58 = vunpack.i.h.bf16 %v3949_v47  ;;  %v3950_v4 = vunpack.i.l.bf16 %v3949_v47  ;;  %v3954_v51 = vpop.permute.xlu1 %3953  ;;  %3599 = vmatprep.subr.bf16.mxu1 %v3598_v45 }
0x138a   : > { %v3956_v52 = vunpack.i.h.bf16 %v3954_v51  ;;  %v3955_v53 = vunpack.i.l.bf16 %v3954_v51  ;;  %3601 = vmatpush3.bf16.msra.mxu1 %v3598_v45 }
0x138b   : > { %v3602_v17 = vpack.c.bf16 %v3951_v58, %v3950_v4 }
0x138c   : > { %v3959_v54 = vpop.permute.xlu0 %3958  ;;  %v3606_v55 = vpack.c.bf16 %v3956_v52, %v3955_v53  ;;  %v2385_v52 = vld [vmem:[#allocation4 + $0x160] sm:$0xff] }
0x138d   : > { %v3961_v56 = vunpack.i.h.bf16 %v3959_v54  ;;  %v3960_v57 = vunpack.i.l.bf16 %v3959_v54  ;;  %3603 = vmatprep.subr.bf16.mxu1 %v3602_v17  ;;  %3359 = vmatprep.mubr.msk.f32.mxu0 %vm770_vm8, %v2385_v52  ;;  %v2388_v53 = vld [vmem:[#allocation6 + $0x160] sm:$0xff] }
0x138e   : > { %3605 = vmatpush3.bf16.msra.mxu1 %v3602_v17  ;;  %v2389_v17 = vld [vmem:[#allocation6 + $0x168] sm:$0xff]  ;;  %v2489_v54 = vld [vmem:[#allocation6 + $0x180] sm:$0xff] }
0x138f   : > { %3607 = vmatprep.subr.bf16.mxu1 %v3606_v55  ;;  %v3610_v59 = vpack.c.bf16 %v3961_v56, %v3960_v57  ;;  %v2491_v56 = vld [vmem:[#allocation6 + $0x190] sm:$0xff]  ;;  %v2492_v57 = vld [vmem:[#allocation6 + $0x198] sm:$0xff] }
0x1392   : > { %3609 = vmatpush3.bf16.msra.mxu1 %v3606_v55  ;;  %v2490_v55 = vld [vmem:[#allocation6 + $0x188] sm:$0xff] }
0x1393   : > { %3611 = vmatprep.subr.bf16.mxu1 %v3610_v59 }
0x1396   : > { %3613 = vmatpush3.bf16.msra.mxu1 %v3610_v59 }
0x1399   : > { %3330 = vmatmul.mubr.msk.f32.vlgmr.msra.gmra.mrb[24].mxu1 %vm770_vm8, %v2203_v61 }
0x139a   : > { %3332 = vmatprep.mubr.msk.f32.mxu1 %vm770_vm8, %v2204_v62  ;;  %v2214_v1 = vpop.permute.xlu1 %2213 }
0x139d   : > { %3333 = vmatmul.mubr.msk.f32.gmra.mrb[26].mxu1 %vm770_vm8, %v2205_v63  ;;  %v2219_v0 = vpop.permute.xlu0 %2218 }
0x139e   : > { %v2224_v19 = vpop.permute.xlu1 %2223 }
0x13a1   : > { %v2229_v10 = vpop.permute.xlu0 %2228 }
0x146c   : > { %v3331_v3 = vpop.f32.mrb[24].mxu1 }
0x146d   : > { %v4638_v5 = vadd.f32 %v3331_v3, %v2219_v0  ;;  %v2309_v6 = vpop.f32.mrb[25].mxu1 }
0x146e   : > { %v4640_v7 = vadd.f32 %v2309_v6, %v2214_v1 }
0x146f   : > { %v2329_v8 = vmax.f32 %v4638_v5, 0.0 }
0x1470   : > { %v2328_v14 = vmax.f32 %v4640_v7, 0.0  ;;  %v3334_v15 = vpop.f32.mrb[26].mxu1 }
0x1471   : > { %v4644_v21 = vadd.f32 %v3334_v15, %v2229_v10  ;;  %v2319_v2 = vpop.f32.mrb[27].mxu1 }
0x1472   : > { %v4646_v25 = vadd.f32 %v2319_v2, %v2224_v19  ;;  %v3962_v26 = vpack.i.bf16 %v2329_v8, %v2328_v14  ;;  %v2484_v8 = vld [vmem:[#allocation4 + $0x180] sm:$0xff] }
0x1473   : > { %v2331_v27 = vmax.f32 %v4644_v21, 0.0  ;;  %3366 = vmatprep.mubr.msk.f32.mxu1 %vm366_vm2, %v2484_v8 }
0x1474   : > { %v2330_v28 = vmax.f32 %v4646_v25, 0.0  ;;  %3963 = vrot.lane.b32.xlu1 %v3962_v26, %s4165_s13 }
0x1476   : > { %v3967_v29 = vpack.i.bf16 %v2331_v27, %v2330_v28 }
0x1478   : > { %3968 = vrot.lane.b32.xlu0 %v3967_v29, %s4165_s13 }
0x14e6   : > { %v3964_v30 = vpop.permute.xlu1 %3963 }
0x14e7   : > { %v3966_v31 = vunpack.i.h.bf16 %v3964_v30  ;;  %v3965_v32 = vunpack.i.l.bf16 %v3964_v30  ;;  %v2485_v30 = vld [vmem:[#allocation4 + $0x188] sm:$0xff] }
0x14e9   : > { %v2349_v33 = vsel %vm702_vm5, 0.0, %v3966_v31  ;;  %v2348_v34 = vsel %vm702_vm5, 0.0, %v3965_v32  ;;  %v2486_v31 = vld [vmem:[#allocation4 + $0x190] sm:$0xff]  ;;  %v2487_v32 = vld [vmem:[#allocation4 + $0x198] sm:$0xff] }
0x14ea   : > { %v2353_v35 = vsel %vm2168_vm11, %v2349_v33, 0.0  ;;  %v2352_v36 = vsel %vm2168_vm11, %v2348_v34, 0.0  ;;  %v3614_v37 = vpack.c.bf16 %v2349_v33, %v2348_v34  ;;  %v3969_v38 = vpop.permute.xlu0 %3968 }
0x14eb   : > { %v3971_v40 = vunpack.i.h.bf16 %v3969_v38  ;;  %v3970_v42 = vunpack.i.l.bf16 %v3969_v38  ;;  %v3972_v43 = vpack.i.bf16 %v2353_v35, %v2352_v36 }
0x14ec   : > { %3616 = vmatprep.subr.msk.bf16.mxu0 %vm4612_vm12, %v3614_v37 }
0x14ed   : > { %v2351_v44 = vsel %vm702_vm5, 0.0, %v3971_v40  ;;  %v2350_v45 = vsel %vm702_vm5, 0.0, %v3970_v42  ;;  %3619 = vmatpush3.bf16.msk.msra.mxu0 %vm4612_vm12, %v3614_v37  ;;  %3973 = vrot.lane.b32.xlu1 %v3972_v43, %s4166_s18 }
0x14ee   : > { %v2355_v47 = vsel %vm2168_vm11, %v2351_v44, 0.0  ;;  %v2354_v58 = vsel %vm2168_vm11, %v2350_v45, 0.0  ;;  %v3620_v4 = vpack.c.bf16 %v2351_v44, %v2350_v45 }
0x14ef   : > { %v3977_v51 = vpack.i.bf16 %v2355_v47, %v2354_v58 }
0x14f0   : > { %3622 = vmatprep.subr.msk.bf16.mxu0 %vm4612_vm12, %v3620_v4 }
0x14f1   : > { %3978 = vrot.lane.b32.xlu0 %v3977_v51, %s4166_s18  ;;  %3625 = vmatpush3.bf16.msk.msra.mxu0 %vm4612_vm12, %v3620_v4 }
0x14f2   : > { %3983 = vrot.lane.b32.xlu1 %v3972_v43, %s4167_s15 }
0x14f5   : > { %3988 = vrot.lane.b32.xlu0 %v3977_v51, %s4167_s15 }
0x14f6   : > { %2392 = vperm.xlu1 %3735, %v2388_v53  }
0x14f9   : > { %2397 = vperm.xlu0 %3736, %v2389_v17  }
0x14fa   : > { %2495 = vperm.xlu1 %3735, %v2489_v54  }
0x14fd   : > { %2500 = vperm.xlu0 %3736, %v2490_v55  }
0x14fe   : > { %2505 = vperm.xlu1 %3735, %v2491_v56  }
0x1501   : > { %2510 = vperm.xlu0 %3736, %v2492_v57  }
0x1502   : > { %2618 = vrot.lane.b32.xlu1 %v1623_v46, %s4171_s29 }
0x1505   : > { %2620 = vrot.lane.b32.xlu0 %v1624_v48, %s4171_s29 }
0x1506   : > { %2622 = vrot.lane.b32.xlu1 %v1625_v12, %s4171_s29 }
0x1509   : > { %2624 = vrot.lane.b32.xlu0 %v1626_v50, %s4171_s29  ;;  %v2386_v50 = vld [vmem:[#allocation4 + $0x168] sm:$0xff] }
0x155f   : > { %v3974_v18 = vpop.permute.xlu1 %3973 }
0x1560   : > { %v3976_v59 = vunpack.i.h.bf16 %v3974_v18  ;;  %v3975_v61 = vunpack.i.l.bf16 %v3974_v18 }
0x1562   : > { %v3626_v62 = vpack.c.bf16 %v3976_v59, %v3975_v61 }
0x1563   : > { %v3979_v63 = vpop.permute.xlu0 %3978 }
0x1564   : > { %v3981_v0 = vunpack.i.h.bf16 %v3979_v63  ;;  %v3980_v1 = vunpack.i.l.bf16 %v3979_v63  ;;  %v3984_v3 = vpop.permute.xlu1 %3983  ;;  %3627 = vmatprep.subr.bf16.mxu0 %v3626_v62 }
0x1565   : > { %v3986_v41 = vunpack.i.h.bf16 %v3984_v3  ;;  %v3985_v46 = vunpack.i.l.bf16 %v3984_v3  ;;  %3629 = vmatpush3.bf16.msra.mxu0 %v3626_v62 }
0x1566   : > { %v3630_v39 = vpack.c.bf16 %v3981_v0, %v3980_v1 }
0x1567   : > { %v3989_v48 = vpop.permute.xlu0 %3988  ;;  %v3634_v6 = vpack.c.bf16 %v3986_v41, %v3985_v46 }
0x1568   : > { %v3991_v9 = vunpack.i.h.bf16 %v3989_v48  ;;  %v3990_v12 = vunpack.i.l.bf16 %v3989_v48  ;;  %3631 = vmatprep.subr.bf16.mxu0 %v3630_v39 }
0x1569   : > { %3633 = vmatpush3.bf16.msra.mxu0 %v3630_v39 }
0x156a   : > { %3635 = vmatprep.subr.bf16.mxu0 %v3634_v6  ;;  %v3638_v49 = vpack.c.bf16 %v3991_v9, %v3990_v12 }
0x156d   : > { %3637 = vmatpush3.bf16.msra.mxu0 %v3634_v6 }
0x156e   : > { %3639 = vmatprep.subr.bf16.mxu0 %v3638_v49 }
0x1571   : > { %3641 = vmatpush3.bf16.msra.mxu0 %v3638_v49 }
0x1574   : > { %3360 = vmatmul.mubr.msk.f32.vlgmr.msra.gmra.mrb[22].mxu0 %vm770_vm8, %v2386_v50 }
0x1575   : > { %v2393_v15 = vpop.permute.xlu1 %2392 }
0x1578   : > { %v2398_v10 = vpop.permute.xlu0 %2397 }
0x1579   : > { %v2496_v34 = vpop.permute.xlu1 %2495 }
0x157c   : > { %v2501_v33 = vpop.permute.xlu0 %2500 }
0x157d   : > { %v2506_v45 = vpop.permute.xlu1 %2505 }
0x1580   : > { %v2511_v42 = vpop.permute.xlu0 %2510 }
0x1581   : > { %v2619_v55 = vpop.permute.xlu1 %2618 }
0x1582   : > { %v2646_v18 = vsel %vm1629_vm9, %v1154_v20, %v2619_v55 }
0x1585   : > { %v2623_v57 = vpop.permute.xlu1 %2622 }
0x1586   : > { %v2648_v13 = vsel %vm1629_vm9, %v1156_v24, %v2623_v57 }
0x1647   : > { %v3361_v14 = vpop.f32.mrb[22].mxu0 }
0x1648   : > { %v2478_v19 = vadd.f32 %v3361_v14, %v2398_v10  ;;  %v2472_v2 = vpop.f32.mrb[23].mxu0 }
0x1649   : > { %v2473_v26 = vadd.f32 %v2472_v2, %v2393_v15 }
0x164a   : > { %v2482_v27 = vmax.f32 %v2478_v19, 0.0 }
0x164b   : > { %v2481_v28 = vmax.f32 %v2473_v26, 0.0 }
0x164d   : > { %v3642_v29 = vpack.c.bf16 %v2482_v27, %v2481_v28 }
0x164f   : > { %3643 = vmatprep.subr.bf16.mxu1 %v3642_v29 }
0x1650   : > { %3645 = vmatpush3.bf16.msra.mxu1 %v3642_v29 }
0x1653   : > { %3367 = vmatmul.mubr.msk.f32.vlgmr.msra.gmra.mrb[28].mxu1 %vm366_vm2, %v2485_v30 }
0x1654   : > { %3369 = vmatprep.mubr.msk.f32.mxu1 %vm366_vm2, %v2486_v31 }
0x1657   : > { %3370 = vmatmul.mubr.msk.f32.gmra.mrb[30].mxu1 %vm366_vm2, %v2487_v32 }
0x1726   : > { %v3368_v35 = vpop.f32.mrb[28].mxu1 }
0x1727   : > { %v2597_v36 = vadd.f32 %v3368_v35, %v2501_v33  ;;  %v2591_v37 = vpop.f32.mrb[29].mxu1 }
0x1728   : > { %v2592_v38 = vadd.f32 %v2591_v37, %v2496_v34 }
0x1729   : > { %v2611_v40 = vadd.f32 %v2597_v36, %v4638_v5 }
0x172a   : > { %v2610_v43 = vadd.f32 %v2592_v38, %v4640_v7  ;;  %v3371_v44 = vpop.f32.mrb[30].mxu1  ;;  %v2621_v7 = vpop.permute.xlu0 %2620 }
0x172b   : > { %v2615_v47 = vmax.f32 %v2611_v40, 0.0  ;;  %v2607_v58 = vadd.f32 %v3371_v44, %v2511_v42  ;;  %v2601_v4 = vpop.f32.mrb[31].mxu1 }
0x172c   : > { %v2614_v51 = vmax.f32 %v2610_v43, 0.0  ;;  %v2602_v52 = vadd.f32 %v2601_v4, %v2506_v45 }
0x172d   : > { %v2613_v53 = vadd.f32 %v2607_v58, %v4644_v21  ;;  %2636 = vrot.lane.b32.xlu0 %v2615_v47, %s4172_s26  ;;  %v2647_v21 = vsel %vm1629_vm9, %v1155_v16, %v2621_v7 }
0x172e   : > { %v2612_v17 = vadd.f32 %v2602_v52, %v4646_v25  ;;  %2634 = vrot.lane.b32.xlu1 %v2614_v51, %s4172_s26  ;;  %v2625_v56 = vpop.permute.xlu0 %2624 }
0x172f   : > { %v2617_v5 = vmax.f32 %v2613_v53, 0.0  ;;  %v2649_v16 = vsel %vm1629_vm9, %v1157_v60, %v2625_v56 }
0x1730   : > { %v2616_v54 = vmax.f32 %v2612_v17, 0.0 }
0x1731   : > { %2640 = vrot.lane.b32.xlu0 %v2617_v5, %s4172_s26 }
0x1732   : > { %2638 = vrot.lane.b32.xlu1 %v2616_v54, %s4172_s26 }
0x179f   : > { %v2637_v25 = vpop.permute.xlu0 %2636 }
0x17a0   : > { %v2651_v59 = vsel %vm366_vm2, %v2647_v21, %v2637_v25  ;;  %v2635_v61 = vpop.permute.xlu1 %2634 }
0x17a1   : > { %v2656_v62 = vsel %vm2654_vm13, %v2651_v59, 0.0  ;;  %v2650_v63 = vsel %vm366_vm2, %v2646_v18, %v2635_v61 }
0x17a2   : > { %2660 = vst [vmem:[%s258_s23 + $0x8] sm:$0xff] %v2656_v62  ;;  %v2655_v11 = vsel %vm2654_vm13, %v2650_v63, 0.0 }
0x17a3   : > { %2659 = vst [vmem:[%s258_s23] sm:$0xff] %v2655_v11  ;;  %v2641_v0 = vpop.permute.xlu0 %2640 }
0x17a4   : > { %v2653_v20 = vsel %vm366_vm2, %v2649_v16, %v2641_v0  ;;  %v2639_v1 = vpop.permute.xlu1 %2638 }
0x17a5   : > { %v2658_v3 = vsel %vm2654_vm13, %v2653_v20, 0.0  ;;  %v2652_v41 = vsel %vm366_vm2, %v2648_v13, %v2639_v1 }
0x17a6   : > { %2662 = vst [vmem:[%s258_s23 + $0x18] sm:$0xff] %v2658_v3  ;;  %v2657_v46 = vsel %vm2654_vm13, %v2652_v41, 0.0 }
0x17a7   : > { %2661 = vst [vmem:[%s258_s23 + $0x10] sm:$0xff] %v2657_v46 }
0x17a8 PF: > { %p16_p9 = scmp.ge.s32.totalorder %s4328_s8, 4   ;;  %s4751_s15 = smov %s4140_s16 }
0x17a9   : > { %s4752_s16 = smov %s4144_s17  ;;  %s4753_s17 = smov %s4338_s6 }
0x17aa   : > { %s4754_s18 = smov %s4328_s8  ;;  %18 = sbr.rel (!%p16_p9) target bundleno = 5 (0x5), region = 115 }
0x17b1   :  { %2684 = vsyncpa [#allocation3], 1 }
0x17b2   :  { %2686 = vsyncpa [#allocation3 + $0x1], 1 }
0x17b3   :  { %2687 = vsyncpa [#allocation5], 1 }
0x17b4   :  { %2688 = vsyncpa [#allocation8], 1 }

</bundles_post_ra>
